<compile_context>
chip_gen: v7x
topology: tpu7x:2x2x1
jax: 0.10.0
libtpu: 0.0.40
codegen_flags: <defaults>
</compile_context>

<pallas_src>
import functools

import jax
import jax.numpy as jnp
from jax import lax
from jax.experimental import pallas as pl
from jax.experimental.pallas import tpu as pltpu

NEG = -1.0e30      # "log zero" (finite so that inf - inf NaNs never appear)
B_TILE = 16        # samples per grid step (2 f32 vregs of sublanes);
                   # kept at 16 (not 32) so small-N workloads still give the
                   # v7x megacore >= 2 batch tiles on the "parallel" axis.
LP = 128           # extended-label axis padded to one lane width


def _ctc_forward_kernel(tml_ref, lc_ref,                    # SMEM prefetch
                        lp_ref, ext_ref, skip_ref, rmask_ref, len_ref,
                        out_ref,
                        oht_ref, alpha_ref, final_ref, em_ref):
    """CTC forward (negative log-likelihood) for B_TILE samples x one chunk."""
    bt = pl.program_id(0)                  # batch-tile index
    tc = pl.program_id(1)                  # time-chunk index
    B = alpha_ref.shape[0]                 # == B_TILE
    Tc = lp_ref.shape[1]                   # timesteps in this chunk
    C = lp_ref.shape[2]                    # classes (not padded)
    Lp = alpha_ref.shape[1]                # == LP
    t0 = tc * Tc                           # global start time of this chunk

    # -- new batch tile: reset carried state, build the one-hot gather matrix
    #    once (it only depends on ext_ref, which is constant over time chunks).
    @pl.when(tc == 0)
    def _():
        pos0 = lax.broadcasted_iota(jnp.int32, (B, Lp), 1)
        alpha_ref[...] = jnp.where(pos0 == 0, 0.0, NEG).astype(jnp.float32)
        final_ref[...] = jnp.full((B, Lp), NEG, dtype=jnp.float32)
        cls = lax.broadcasted_iota(jnp.int32, (C, Lp), 0)
        for b in range(B):                                     # static unroll
            oht_ref[b] = (cls == ext_ref[pl.ds(b, 1), :]).astype(jnp.float32)
        # TODO(synk): for very large C, build/store the one-hot in bf16 and in
        # C-chunks so the (B_TILE, C, 128) scratch stays inside v7x's VMEM.

    # longest valid input length within this batch tile (precomputed, SMEM)
    max_len = tml_ref[bt]

    # -- chunk body: emission gather (MXU) + serial alpha recursion ----------
    @pl.when(t0 < max_len)
    def _():
        # em[b, t, s] = log_probs[b, t0 + t, ext[b, s]]  via one-hot matmul.
        for b in range(B):                                     # static unroll
            em_ref[b] = jnp.dot(lp_ref[b], oht_ref[b],
                                preferred_element_type=jnp.float32)

        pos = lax.broadcasted_iota(jnp.int32, (B, Lp), 1)
        edge1 = jnp.where(pos >= 1, 0.0, NEG).astype(jnp.float32)  # s-1 edge
        skip2 = skip_ref[...]                # s-2 edge + "skip allowed" mask
        t_last = jnp.broadcast_to(len_ref[...] - 1, (B, Lp))       # int32

        n_steps = jnp.minimum(max_len - t0, Tc)   # only the needed timesteps

        def body(t, carry):
            alpha, final = carry
            a1 = pltpu.roll(alpha, shift=1, axis=1) + edge1        # alpha[s-1]
            a2 = pltpu.roll(alpha, shift=2, axis=1) + skip2        # alpha[s-2]
            # m is an elementwise max of the three operands, so every exp
            # argument is <= 0: no overflow, underflow is harmless (-> 0).
            m = jnp.maximum(jnp.maximum(alpha, a1), a2)
            lse = m + jnp.log(jnp.exp(alpha - m) + jnp.exp(a1 - m)
                              + jnp.exp(a2 - m))
            # This timestep's emissions for the B samples.  These loads do not
            # depend on alpha, so they hide under the exp/log dependency chain.
            em_t = jnp.concatenate(
                [em_ref[b, pl.ds(t, 1), :] for b in range(B)], axis=0)
            alpha_new = em_t + lse
            final_new = jnp.where(t0 + t == t_last, alpha_new, final)
            return alpha_new, final_new

        alpha, final = lax.fori_loop(0, n_steps, body,
                                     (alpha_ref[...], final_ref[...]))
        alpha_ref[...] = alpha
        final_ref[...] = final

    # -- last chunk: -log p(target) from the two terminal states -------------
    @pl.when(tc == pl.num_programs(1) - 1)
    def _():
        masked = jnp.where(rmask_ref[...] > 0, final_ref[...], NEG)
        m = jnp.max(masked, axis=-1, keepdims=True)
        z = jnp.sum(jnp.exp(masked - m), axis=-1, keepdims=True)
        out_ref[...] = -(m + jnp.log(z))                           # (B, 1)


def _ghm_kernel(raw_ref, il_ref, ema_ref, loss_ref, ema_out_ref, *,
                num_bins, alpha):
    """GHM weighting, histogram, EMA update and mean reduction (lane-dense)."""
    raw = raw_ref[...]                         # (1, N)  per-sample CTC NLL
    # guard input_lengths == 0 (would divide by zero exactly like the PyTorch
    # reference); for the normal case (length >= 1) this is a no-op.
    il = jnp.maximum(il_ref[...], 1.0)         # (1, N)
    ema_col = ema_ref[...]                     # (NB, 1)
    n = raw.shape[1]

    lfe = jnp.clip(jnp.exp(-raw / il), 1e-6, 1.0 - 1e-6)        # loss_for_ema
    bin_idx = jnp.clip(jnp.floor(lfe * num_bins).astype(jnp.int32),
                       0, num_bins - 1)                         # (1, N)
    bins = lax.broadcasted_iota(jnp.int32, (num_bins, n), 0)
    onehot = (bins == bin_idx).astype(jnp.float32)              # (NB, N)

    weights = jnp.sum(onehot * ema_col, axis=0, keepdims=True)  # ema[bin_idx]
    loss_w = raw / (weights + 1e-10)
    loss_ref[...] = jnp.sum(loss_w, axis=1, keepdims=True) / float(n)

    hist = jnp.sum(onehot, axis=1, keepdims=True)               # (NB, 1)
    hist = hist / jnp.maximum(jnp.sum(hist, axis=0, keepdims=True),
                              1e-10) * float(num_bins)
    ema_new = ema_col * alpha + (1.0 - alpha) * hist
    ema_new = ema_new / jnp.maximum(jnp.sum(ema_new, axis=0, keepdims=True),
                                    1e-10) * float(num_bins)
    ema_out_ref[...] = ema_new


def ctc_ghm_loss(log_probs, targets, input_lengths, target_lengths, ema,
                 num_bins=10, alpha=0.999, valid=False, t_chunk=512):
    """Returns (scalar GHM-weighted CTC loss, updated ema buffer)."""
    T, N, C = log_probs.shape
    if T == 0 or N == 0:
        return jnp.float32(0.0), ema

    Smax = targets.shape[1]
    L = 2 * Smax + 1
    assert L <= LP, "extended label sequence must fit in 128 lanes (Smax <= 63)"

    # ---- tiling: B_TILE samples per grid step, time in VMEM-bounded chunks -
    Np = -(-N // B_TILE) * B_TILE
    num_bt = Np // B_TILE

    # VMEM budget (safe on v5e/v6e/v7x): 2x double-buffered lp block +
    # emission scratch + hoisted one-hot scratch + small carries <= ~22 MiB.
    budget = 22 * 1024 * 1024
    oht_bytes = B_TILE * (-(-C // 8) * 8) * LP * 4
    fixed = oht_bytes + 4 * B_TILE * LP * 4
    per_t = B_TILE * 4 * (2 * C + LP)
    cap_t = max(8, (budget - fixed) // per_t)
    tc_eff = min(t_chunk, cap_t, -(-T // 8) * 8)
    tc_eff = max(8, (tc_eff // 8) * 8)
    num_tc = -(-T // tc_eff)

    # ---- log_probs: single transpose to (N, T, C); no padding copies -------
    lp = jnp.transpose(log_probs, (1, 0, 2)).astype(jnp.float32)   # (N, T, C)
    # TODO(synk): this transpose is still one extra HBM round-trip of the
    # largest tensor; fusing it into the producer would remove it.

    # ---- host-side glue: label-derived masks (O(N*LP), tiny) ---------------
    tgt = targets.astype(jnp.int32)
    ext = jnp.zeros((N, LP), jnp.int32)
    if Smax > 0:
        ext = ext.at[:, 1:2 * Smax:2].set(tgt)

    s_idx = jnp.arange(LP)
    odd_skip = (s_idx % 2 == 1) & (s_idx >= 3) & (s_idx < L)
    if Smax > 0:
        cur = jnp.clip((s_idx - 1) // 2, 0, Smax - 1)
        prv = jnp.clip((s_idx - 3) // 2, 0, Smax - 1)
        diff = tgt[:, cur] != tgt[:, prv]                          # (N, LP)
    else:
        diff = jnp.zeros((N, LP), dtype=bool)
    # additive mask: 0 where the s-2 skip transition is allowed, NEG otherwise
    skip_add = jnp.where(odd_skip[None, :] & diff, 0.0, NEG).astype(jnp.float32)

    posL = jnp.arange(LP)[None, :]
    end = (2 * target_lengths.astype(jnp.int32))[:, None]
    rmask = ((posL == end) | (posL == end - 1)).astype(jnp.float32)

    il = jnp.minimum(input_lengths.astype(jnp.int32), T)

    pad_n = Np - N
    ext = jnp.pad(ext, ((0, pad_n), (0, 0)))
    skip_add = jnp.pad(skip_add, ((0, pad_n), (0, 0)), constant_values=NEG)
    rmask = jnp.pad(rmask, ((0, pad_n), (0, 0)))
    il_pad = jnp.pad(il, (0, pad_n))                               # (Np,)
    len_col = il_pad[:, None]                                      # (Np, 1)

    # per-tile max length + last needed time-chunk (scalar prefetch, SMEM)
    tile_max = jnp.max(il_pad.reshape(num_bt, B_TILE), axis=1).astype(jnp.int32)
    last_chunk = jnp.maximum(-(-tile_max // tc_eff) - 1, 0).astype(jnp.int32)

    # ---- kernel 1: per-sample CTC negative log-likelihood ------------------
    grid_spec = pltpu.PrefetchScalarGridSpec(
        num_scalar_prefetch=2,
        grid=(num_bt, num_tc),
        in_specs=[
            # clamp the time block for fully-skipped chunks -> no re-fetch DMA
            pl.BlockSpec((B_TILE, tc_eff, C),
                         lambda bt, tc, tml, lc: (bt, jnp.minimum(tc, lc[bt]), 0)),
            pl.BlockSpec((B_TILE, LP), lambda bt, tc, tml, lc: (bt, 0)),
            pl.BlockSpec((B_TILE, LP), lambda bt, tc, tml, lc: (bt, 0)),
            pl.BlockSpec((B_TILE, LP), lambda bt, tc, tml, lc: (bt, 0)),
            pl.BlockSpec((B_TILE, 1), lambda bt, tc, tml, lc: (bt, 0)),
        ],
        out_specs=pl.BlockSpec((B_TILE, 1), lambda bt, tc, tml, lc: (bt, 0)),
        scratch_shapes=[
            pltpu.VMEM((B_TILE, C, LP), jnp.float32),         # hoisted one-hot
            pltpu.VMEM((B_TILE, LP), jnp.float32),            # alpha carry
            pltpu.VMEM((B_TILE, LP), jnp.float32),            # final carry
            pltpu.VMEM((B_TILE, tc_eff, LP), jnp.float32),    # emissions
        ],
    )
    raw_out = pl.pallas_call(
        _ctc_forward_kernel,
        out_shape=jax.ShapeDtypeStruct((Np, 1), jnp.float32),
        grid_spec=grid_spec,
        compiler_params=pltpu.CompilerParams(
            dimension_semantics=("parallel", "arbitrary"),
            vmem_limit_bytes=32 * 1024 * 1024),
    )(tile_max, last_chunk, lp, ext, skip_add, rmask, len_col)

    # ---- kernel 2: GHM weighting / histogram / EMA update / mean -----------
    raw_row = raw_out[:N, 0].reshape(1, N)
    il_row = input_lengths.astype(jnp.float32).reshape(1, N)
    ema_col = ema.astype(jnp.float32).reshape(num_bins, 1)

    loss, ema_new = pl.pallas_call(
        functools.partial(_ghm_kernel, num_bins=num_bins, alpha=alpha),
        out_shape=(jax.ShapeDtypeStruct((1, 1), jnp.float32),
                   jax.ShapeDtypeStruct((num_bins, 1), jnp.float32)),
        grid=(1,),
        in_specs=[pl.BlockSpec((1, N), lambda i: (0, 0)),
                  pl.BlockSpec((1, N), lambda i: (0, 0)),
                  pl.BlockSpec((num_bins, 1), lambda i: (0, 0))],
        out_specs=(pl.BlockSpec((1, 1), lambda i: (0, 0)),
                   pl.BlockSpec((num_bins, 1), lambda i: (0, 0))),
    )(raw_row, il_row, ema_col)

    # valid=True: no EMA update (matches the PyTorch `if not valid:` branch)
    new_ema = ema if valid else ema_new.reshape(num_bins).astype(ema.dtype)
    return loss[0, 0], new_ema


if __name__ == "__main__":
    key = jax.random.PRNGKey(0)
    T, N, C, Smax, NB = 16, 2, 8, 4, 10
    k1, k2 = jax.random.split(key)

    logits = jax.random.normal(k1, (T, N, C), dtype=jnp.float32)
    log_probs = jax.nn.log_softmax(logits, axis=-1)                # (T, N, C)
    targets = jax.random.randint(k2, (N, Smax), 1, C, dtype=jnp.int32)
    input_lengths = jnp.array([16, 12], dtype=jnp.int32)
    target_lengths = jnp.array([4, 3], dtype=jnp.int32)
    ema = jnp.ones((NB,), dtype=jnp.float32)                       # buffer init

    loss, new_ema = ctc_ghm_loss(log_probs, targets, input_lengths,
                                 target_lengths, ema,
                                 num_bins=NB, alpha=0.999, valid=False)
    jax.block_until_ready((loss, new_ema))
    print("KERNEL_OK")
</pallas_src>

<mosaic_0001>
module attributes {stable_mosaic.version = 11 : i64} {
  func.func @_ctc_forward_kernel(%arg0: i32, %arg1: i32, %arg2: memref<1xi32, #tpu.memory_space<smem>>, %arg3: memref<1xi32, #tpu.memory_space<smem>>, %arg4: memref<16x16x8xf32, #tpu.memory_space<vmem>>, %arg5: memref<16x128xi32, #tpu.memory_space<vmem>>, %arg6: memref<16x128xf32, #tpu.memory_space<vmem>>, %arg7: memref<16x128xf32, #tpu.memory_space<vmem>>, %arg8: memref<16x1xi32, #tpu.memory_space<vmem>>, %arg9: memref<16x1xf32, #tpu.memory_space<vmem>>, %arg10: memref<16x8x128xf32, #tpu.memory_space<vmem>>, %arg11: memref<16x128xf32, #tpu.memory_space<vmem>>, %arg12: memref<16x128xf32, #tpu.memory_space<vmem>>, %arg13: memref<16x16x128xf32, #tpu.memory_space<vmem>>) attributes {dimension_semantics = [#tpu.dimension_semantics<parallel>, #tpu.dimension_semantics<arbitrary>], iteration_bounds = array<i64: 1, 1>, scalar_prefetch = 2 : i64, scratch_operands = 4 : i64, tpu.core_type = #tpu.core_type<tc>, window_params = [{transform_indices = @transform_0, window_bounds = array<i64: 16, 16, 8>}, {transform_indices = @transform_1, window_bounds = array<i64: 16, 128>}, {transform_indices = @transform_2, window_bounds = array<i64: 16, 128>}, {transform_indices = @transform_3, window_bounds = array<i64: 16, 128>}, {transform_indices = @transform_4, window_bounds = array<i64: 16, 1>}, {transform_indices = @transform_5, window_bounds = array<i64: 16, 1>}]} {
    %c16_i32 = arith.constant 16 : i32
    %0 = arith.muli %arg1, %c16_i32 : i32
    %c0_i32 = arith.constant 0 : i32
    %1 = arith.cmpi eq, %arg1, %c0_i32 : i32
    %2 = arith.extui %1 : i1 to i32
    %c0_i32_0 = arith.constant 0 : i32
    %3 = arith.cmpi ne, %2, %c0_i32_0 : i32
    scf.if %3 {
      %12 = tpu.iota {dimensions = array<i32: 1>} : vector<16x128xi32>
      %c0_i32_4 = arith.constant 0 : i32
      %13 = vector.broadcast %c0_i32_4 : i32 to vector<16x128xi32>
      %14 = arith.cmpi eq, %12, %13 : vector<16x128xi32>
      %cst = arith.constant 0.000000e+00 : f32
      %cst_5 = arith.constant -1.000000e+30 : f32
      %15 = vector.broadcast %cst : f32 to vector<16x128xf32>
      %16 = vector.broadcast %cst_5 : f32 to vector<16x128xf32>
      %17 = arith.select %14, %15, %16 : vector<16x128xi1>, vector<16x128xf32>
      %c0 = arith.constant 0 : index
      %c0_6 = arith.constant 0 : index
      %18 = vector.load %arg11[%c0, %c0_6] : memref<16x128xf32, #tpu.memory_space<vmem>>, vector<16x128xf32>
      tpu.vector_store %arg11[%c0, %c0_6], %17 {strides = array<i32>} : memref<16x128xf32, #tpu.memory_space<vmem>>, vector<16x128xf32>,
      %cst_7 = arith.constant -1.000000e+30 : f32
      %19 = vector.broadcast %cst_7 : f32 to vector<16x128xf32>
      %c0_8 = arith.constant 0 : index
      %c0_9 = arith.constant 0 : index
      %20 = vector.load %arg12[%c0_8, %c0_9] : memref<16x128xf32, #tpu.memory_space<vmem>>, vector<16x128xf32>
      tpu.vector_store %arg12[%c0_8, %c0_9], %19 {strides = array<i32>} : memref<16x128xf32, #tpu.memory_space<vmem>>, vector<16x128xf32>,
      %21 = tpu.iota {dimensions = array<i32: 0>} : vector<8x128xi32>
      %c0_10 = arith.constant 0 : index
      %c0_11 = arith.constant 0 : index
      %22 = vector.load %arg5[%c0_10, %c0_11] : memref<16x128xi32, #tpu.memory_space<vmem>>, vector<1x128xi32>
      %23 = vector.broadcast %22 : vector<1x128xi32> to vector<8x128xi32>
      %24 = arith.cmpi eq, %21, %23 : vector<8x128xi32>
      %25 = arith.extui %24 : vector<8x128xi1> to vector<8x128xi32>
      %26 = arith.sitofp %25 : vector<8x128xi32> to vector<8x128xf32>
      %c0_12 = arith.constant 0 : index
      %c0_13 = arith.constant 0 : index
      %c0_14 = arith.constant 0 : index
      %27 = vector.load %arg10[%c0_12, %c0_13, %c0_14] : memref<16x8x128xf32, #tpu.memory_space<vmem>>, vector<1x8x128xf32>
      %28 = vector.shape_cast %27 : vector<1x8x128xf32> to vector<8x128xf32>
      %29 = vector.shape_cast %26 : vector<8x128xf32> to vector<1x8x128xf32>
      tpu.vector_store %arg10[%c0_12, %c0_13, %c0_14], %29 {strides = array<i32>} : memref<16x8x128xf32, #tpu.memory_space<vmem>>, vector<1x8x128xf32>,
      %c1 = arith.constant 1 : index
      %c0_15 = arith.constant 0 : index
      %30 = vector.load %arg5[%c1, %c0_15] : memref<16x128xi32, #tpu.memory_space<vmem>>, vector<1x128xi32>
      %31 = vector.broadcast %30 : vector<1x128xi32> to vector<8x128xi32>
      %32 = arith.cmpi eq, %21, %31 : vector<8x128xi32>
      %33 = arith.extui %32 : vector<8x128xi1> to vector<8x128xi32>
      %34 = arith.sitofp %33 : vector<8x128xi32> to vector<8x128xf32>
      %c1_16 = arith.constant 1 : index
      %c0_17 = arith.constant 0 : index
      %c0_18 = arith.constant 0 : index
      %35 = vector.load %arg10[%c1_16, %c0_17, %c0_18] : memref<16x8x128xf32, #tpu.memory_space<vmem>>, vector<1x8x128xf32>
      %36 = vector.shape_cast %35 : vector<1x8x128xf32> to vector<8x128xf32>
      %37 = vector.shape_cast %34 : vector<8x128xf32> to vector<1x8x128xf32>
      tpu.vector_store %arg10[%c1_16, %c0_17, %c0_18], %37 {strides = array<i32>} : memref<16x8x128xf32, #tpu.memory_space<vmem>>, vector<1x8x128xf32>,
      %c2 = arith.constant 2 : index
      %c0_19 = arith.constant 0 : index
      %38 = vector.load %arg5[%c2, %c0_19] : memref<16x128xi32, #tpu.memory_space<vmem>>, vector<1x128xi32>
      %39 = vector.broadcast %38 : vector<1x128xi32> to vector<8x128xi32>
      %40 = arith.cmpi eq, %21, %39 : vector<8x128xi32>
      %41 = arith.extui %40 : vector<8x128xi1> to vector<8x128xi32>
      %42 = arith.sitofp %41 : vector<8x128xi32> to vector<8x128xf32>
      %c2_20 = arith.constant 2 : index
      %c0_21 = arith.constant 0 : index
      %c0_22 = arith.constant 0 : index
      %43 = vector.load %arg10[%c2_20, %c0_21, %c0_22] : memref<16x8x128xf32, #tpu.memory_space<vmem>>, vector<1x8x128xf32>
      %44 = vector.shape_cast %43 : vector<1x8x128xf32> to vector<8x128xf32>
      %45 = vector.shape_cast %42 : vector<8x128xf32> to vector<1x8x128xf32>
      tpu.vector_store %arg10[%c2_20, %c0_21, %c0_22], %45 {strides = array<i32>} : memref<16x8x128xf32, #tpu.memory_space<vmem>>, vector<1x8x128xf32>,
      %c3 = arith.constant 3 : index
      %c0_23 = arith.constant 0 : index
      %46 = vector.load %arg5[%c3, %c0_23] : memref<16x128xi32, #tpu.memory_space<vmem>>, vector<1x128xi32>
      %47 = vector.broadcast %46 : vector<1x128xi32> to vector<8x128xi32>
      %48 = arith.cmpi eq, %21, %47 : vector<8x128xi32>
      %49 = arith.extui %48 : vector<8x128xi1> to vector<8x128xi32>
      %50 = arith.sitofp %49 : vector<8x128xi32> to vector<8x128xf32>
      %c3_24 = arith.constant 3 : index
      %c0_25 = arith.constant 0 : index
      %c0_26 = arith.constant 0 : index
      %51 = vector.load %arg10[%c3_24, %c0_25, %c0_26] : memref<16x8x128xf32, #tpu.memory_space<vmem>>, vector<1x8x128xf32>
      %52 = vector.shape_cast %51 : vector<1x8x128xf32> to vector<8x128xf32>
      %53 = vector.shape_cast %50 : vector<8x128xf32> to vector<1x8x128xf32>
      tpu.vector_store %arg10[%c3_24, %c0_25, %c0_26], %53 {strides = array<i32>} : memref<16x8x128xf32, #tpu.memory_space<vmem>>, vector<1x8x128xf32>,
      %c4 = arith.constant 4 : index
      %c0_27 = arith.constant 0 : index
      %54 = vector.load %arg5[%c4, %c0_27] : memref<16x128xi32, #tpu.memory_space<vmem>>, vector<1x128xi32>
      %55 = vector.broadcast %54 : vector<1x128xi32> to vector<8x128xi32>
      %56 = arith.cmpi eq, %21, %55 : vector<8x128xi32>
      %57 = arith.extui %56 : vector<8x128xi1> to vector<8x128xi32>
      %58 = arith.sitofp %57 : vector<8x128xi32> to vector<8x128xf32>
      %c4_28 = arith.constant 4 : index
      %c0_29 = arith.constant 0 : index
      %c0_30 = arith.constant 0 : index
      %59 = vector.load %arg10[%c4_28, %c0_29, %c0_30] : memref<16x8x128xf32, #tpu.memory_space<vmem>>, vector<1x8x128xf32>
      %60 = vector.shape_cast %59 : vector<1x8x128xf32> to vector<8x128xf32>
      %61 = vector.shape_cast %58 : vector<8x128xf32> to vector<1x8x128xf32>
      tpu.vector_store %arg10[%c4_28, %c0_29, %c0_30], %61 {strides = array<i32>} : memref<16x8x128xf32, #tpu.memory_space<vmem>>, vector<1x8x128xf32>,
      %c5 = arith.constant 5 : index
      %c0_31 = arith.constant 0 : index
      %62 = vector.load %arg5[%c5, %c0_31] : memref<16x128xi32, #tpu.memory_space<vmem>>, vector<1x128xi32>
      %63 = vector.broadcast %62 : vector<1x128xi32> to vector<8x128xi32>
      %64 = arith.cmpi eq, %21, %63 : vector<8x128xi32>
      %65 = arith.extui %64 : vector<8x128xi1> to vector<8x128xi32>
      %66 = arith.sitofp %65 : vector<8x128xi32> to vector<8x128xf32>
      %c5_32 = arith.constant 5 : index
      %c0_33 = arith.constant 0 : index
      %c0_34 = arith.constant 0 : index
      %67 = vector.load %arg10[%c5_32, %c0_33, %c0_34] : memref<16x8x128xf32, #tpu.memory_space<vmem>>, vector<1x8x128xf32>
      %68 = vector.shape_cast %67 : vector<1x8x128xf32> to vector<8x128xf32>
      %69 = vector.shape_cast %66 : vector<8x128xf32> to vector<1x8x128xf32>
      tpu.vector_store %arg10[%c5_32, %c0_33, %c0_34], %69 {strides = array<i32>} : memref<16x8x128xf32, #tpu.memory_space<vmem>>, vector<1x8x128xf32>,
      %c6 = arith.constant 6 : index
      %c0_35 = arith.constant 0 : index
      %70 = vector.load %arg5[%c6, %c0_35] : memref<16x128xi32, #tpu.memory_space<vmem>>, vector<1x128xi32>
      %71 = vector.broadcast %70 : vector<1x128xi32> to vector<8x128xi32>
      %72 = arith.cmpi eq, %21, %71 : vector<8x128xi32>
      %73 = arith.extui %72 : vector<8x128xi1> to vector<8x128xi32>
      %74 = arith.sitofp %73 : vector<8x128xi32> to vector<8x128xf32>
      %c6_36 = arith.constant 6 : index
      %c0_37 = arith.constant 0 : index
      %c0_38 = arith.constant 0 : index
      %75 = vector.load %arg10[%c6_36, %c0_37, %c0_38] : memref<16x8x128xf32, #tpu.memory_space<vmem>>, vector<1x8x128xf32>
      %76 = vector.shape_cast %75 : vector<1x8x128xf32> to vector<8x128xf32>
      %77 = vector.shape_cast %74 : vector<8x128xf32> to vector<1x8x128xf32>
      tpu.vector_store %arg10[%c6_36, %c0_37, %c0_38], %77 {strides = array<i32>} : memref<16x8x128xf32, #tpu.memory_space<vmem>>, vector<1x8x128xf32>,
      %c7 = arith.constant 7 : index
      %c0_39 = arith.constant 0 : index
      %78 = vector.load %arg5[%c7, %c0_39] : memref<16x128xi32, #tpu.memory_space<vmem>>, vector<1x128xi32>
      %79 = vector.broadcast %78 : vector<1x128xi32> to vector<8x128xi32>
      %80 = arith.cmpi eq, %21, %79 : vector<8x128xi32>
      %81 = arith.extui %80 : vector<8x128xi1> to vector<8x128xi32>
      %82 = arith.sitofp %81 : vector<8x128xi32> to vector<8x128xf32>
      %c7_40 = arith.constant 7 : index
      %c0_41 = arith.constant 0 : index
      %c0_42 = arith.constant 0 : index
      %83 = vector.load %arg10[%c7_40, %c0_41, %c0_42] : memref<16x8x128xf32, #tpu.memory_space<vmem>>, vector<1x8x128xf32>
      %84 = vector.shape_cast %83 : vector<1x8x128xf32> to vector<8x128xf32>
      %85 = vector.shape_cast %82 : vector<8x128xf32> to vector<1x8x128xf32>
      tpu.vector_store %arg10[%c7_40, %c0_41, %c0_42], %85 {strides = array<i32>} : memref<16x8x128xf32, #tpu.memory_space<vmem>>, vector<1x8x128xf32>,
      %c8 = arith.constant 8 : index
      %c0_43 = arith.constant 0 : index
      %86 = vector.load %arg5[%c8, %c0_43] : memref<16x128xi32, #tpu.memory_space<vmem>>, vector<1x128xi32>
      %87 = vector.broadcast %86 : vector<1x128xi32> to vector<8x128xi32>
      %88 = arith.cmpi eq, %21, %87 : vector<8x128xi32>
      %89 = arith.extui %88 : vector<8x128xi1> to vector<8x128xi32>
      %90 = arith.sitofp %89 : vector<8x128xi32> to vector<8x128xf32>
      %c8_44 = arith.constant 8 : index
      %c0_45 = arith.constant 0 : index
      %c0_46 = arith.constant 0 : index
      %91 = vector.load %arg10[%c8_44, %c0_45, %c0_46] : memref<16x8x128xf32, #tpu.memory_space<vmem>>, vector<1x8x128xf32>
      %92 = vector.shape_cast %91 : vector<1x8x128xf32> to vector<8x128xf32>
      %93 = vector.shape_cast %90 : vector<8x128xf32> to vector<1x8x128xf32>
      tpu.vector_store %arg10[%c8_44, %c0_45, %c0_46], %93 {strides = array<i32>} : memref<16x8x128xf32, #tpu.memory_space<vmem>>, vector<1x8x128xf32>,
      %c9 = arith.constant 9 : index
      %c0_47 = arith.constant 0 : index
      %94 = vector.load %arg5[%c9, %c0_47] : memref<16x128xi32, #tpu.memory_space<vmem>>, vector<1x128xi32>
      %95 = vector.broadcast %94 : vector<1x128xi32> to vector<8x128xi32>
      %96 = arith.cmpi eq, %21, %95 : vector<8x128xi32>
      %97 = arith.extui %96 : vector<8x128xi1> to vector<8x128xi32>
      %98 = arith.sitofp %97 : vector<8x128xi32> to vector<8x128xf32>
      %c9_48 = arith.constant 9 : index
      %c0_49 = arith.constant 0 : index
      %c0_50 = arith.constant 0 : index
      %99 = vector.load %arg10[%c9_48, %c0_49, %c0_50] : memref<16x8x128xf32, #tpu.memory_space<vmem>>, vector<1x8x128xf32>
      %100 = vector.shape_cast %99 : vector<1x8x128xf32> to vector<8x128xf32>
      %101 = vector.shape_cast %98 : vector<8x128xf32> to vector<1x8x128xf32>
      tpu.vector_store %arg10[%c9_48, %c0_49, %c0_50], %101 {strides = array<i32>} : memref<16x8x128xf32, #tpu.memory_space<vmem>>, vector<1x8x128xf32>,
      %c10 = arith.constant 10 : index
      %c0_51 = arith.constant 0 : index
      %102 = vector.load %arg5[%c10, %c0_51] : memref<16x128xi32, #tpu.memory_space<vmem>>, vector<1x128xi32>
      %103 = vector.broadcast %102 : vector<1x128xi32> to vector<8x128xi32>
      %104 = arith.cmpi eq, %21, %103 : vector<8x128xi32>
      %105 = arith.extui %104 : vector<8x128xi1> to vector<8x128xi32>
      %106 = arith.sitofp %105 : vector<8x128xi32> to vector<8x128xf32>
      %c10_52 = arith.constant 10 : index
      %c0_53 = arith.constant 0 : index
      %c0_54 = arith.constant 0 : index
      %107 = vector.load %arg10[%c10_52, %c0_53, %c0_54] : memref<16x8x128xf32, #tpu.memory_space<vmem>>, vector<1x8x128xf32>
      %108 = vector.shape_cast %107 : vector<1x8x128xf32> to vector<8x128xf32>
      %109 = vector.shape_cast %106 : vector<8x128xf32> to vector<1x8x128xf32>
      tpu.vector_store %arg10[%c10_52, %c0_53, %c0_54], %109 {strides = array<i32>} : memref<16x8x128xf32, #tpu.memory_space<vmem>>, vector<1x8x128xf32>,
      %c11 = arith.constant 11 : index
      %c0_55 = arith.constant 0 : index
      %110 = vector.load %arg5[%c11, %c0_55] : memref<16x128xi32, #tpu.memory_space<vmem>>, vector<1x128xi32>
      %111 = vector.broadcast %110 : vector<1x128xi32> to vector<8x128xi32>
      %112 = arith.cmpi eq, %21, %111 : vector<8x128xi32>
      %113 = arith.extui %112 : vector<8x128xi1> to vector<8x128xi32>
      %114 = arith.sitofp %113 : vector<8x128xi32> to vector<8x128xf32>
      %c11_56 = arith.constant 11 : index
      %c0_57 = arith.constant 0 : index
      %c0_58 = arith.constant 0 : index
      %115 = vector.load %arg10[%c11_56, %c0_57, %c0_58] : memref<16x8x128xf32, #tpu.memory_space<vmem>>, vector<1x8x128xf32>
      %116 = vector.shape_cast %115 : vector<1x8x128xf32> to vector<8x128xf32>
      %117 = vector.shape_cast %114 : vector<8x128xf32> to vector<1x8x128xf32>
      tpu.vector_store %arg10[%c11_56, %c0_57, %c0_58], %117 {strides = array<i32>} : memref<16x8x128xf32, #tpu.memory_space<vmem>>, vector<1x8x128xf32>,
      %c12 = arith.constant 12 : index
      %c0_59 = arith.constant 0 : index
      %118 = vector.load %arg5[%c12, %c0_59] : memref<16x128xi32, #tpu.memory_space<vmem>>, vector<1x128xi32>
      %119 = vector.broadcast %118 : vector<1x128xi32> to vector<8x128xi32>
      %120 = arith.cmpi eq, %21, %119 : vector<8x128xi32>
      %121 = arith.extui %120 : vector<8x128xi1> to vector<8x128xi32>
      %122 = arith.sitofp %121 : vector<8x128xi32> to vector<8x128xf32>
      %c12_60 = arith.constant 12 : index
      %c0_61 = arith.constant 0 : index
      %c0_62 = arith.constant 0 : index
      %123 = vector.load %arg10[%c12_60, %c0_61, %c0_62] : memref<16x8x128xf32, #tpu.memory_space<vmem>>, vector<1x8x128xf32>
      %124 = vector.shape_cast %123 : vector<1x8x128xf32> to vector<8x128xf32>
      %125 = vector.shape_cast %122 : vector<8x128xf32> to vector<1x8x128xf32>
      tpu.vector_store %arg10[%c12_60, %c0_61, %c0_62], %125 {strides = array<i32>} : memref<16x8x128xf32, #tpu.memory_space<vmem>>, vector<1x8x128xf32>,
      %c13 = arith.constant 13 : index
      %c0_63 = arith.constant 0 : index
      %126 = vector.load %arg5[%c13, %c0_63] : memref<16x128xi32, #tpu.memory_space<vmem>>, vector<1x128xi32>
      %127 = vector.broadcast %126 : vector<1x128xi32> to vector<8x128xi32>
      %128 = arith.cmpi eq, %21, %127 : vector<8x128xi32>
      %129 = arith.extui %128 : vector<8x128xi1> to vector<8x128xi32>
      %130 = arith.sitofp %129 : vector<8x128xi32> to vector<8x128xf32>
      %c13_64 = arith.constant 13 : index
      %c0_65 = arith.constant 0 : index
      %c0_66 = arith.constant 0 : index
      %131 = vector.load %arg10[%c13_64, %c0_65, %c0_66] : memref<16x8x128xf32, #tpu.memory_space<vmem>>, vector<1x8x128xf32>
      %132 = vector.shape_cast %131 : vector<1x8x128xf32> to vector<8x128xf32>
      %133 = vector.shape_cast %130 : vector<8x128xf32> to vector<1x8x128xf32>
      tpu.vector_store %arg10[%c13_64, %c0_65, %c0_66], %133 {strides = array<i32>} : memref<16x8x128xf32, #tpu.memory_space<vmem>>, vector<1x8x128xf32>,
      %c14 = arith.constant 14 : index
      %c0_67 = arith.constant 0 : index
      %134 = vector.load %arg5[%c14, %c0_67] : memref<16x128xi32, #tpu.memory_space<vmem>>, vector<1x128xi32>
      %135 = vector.broadcast %134 : vector<1x128xi32> to vector<8x128xi32>
      %136 = arith.cmpi eq, %21, %135 : vector<8x128xi32>
      %137 = arith.extui %136 : vector<8x128xi1> to vector<8x128xi32>
      %138 = arith.sitofp %137 : vector<8x128xi32> to vector<8x128xf32>
      %c14_68 = arith.constant 14 : index
      %c0_69 = arith.constant 0 : index
      %c0_70 = arith.constant 0 : index
      %139 = vector.load %arg10[%c14_68, %c0_69, %c0_70] : memref<16x8x128xf32, #tpu.memory_space<vmem>>, vector<1x8x128xf32>
      %140 = vector.shape_cast %139 : vector<1x8x128xf32> to vector<8x128xf32>
      %141 = vector.shape_cast %138 : vector<8x128xf32> to vector<1x8x128xf32>
      tpu.vector_store %arg10[%c14_68, %c0_69, %c0_70], %141 {strides = array<i32>} : memref<16x8x128xf32, #tpu.memory_space<vmem>>, vector<1x8x128xf32>,
      %c15 = arith.constant 15 : index
      %c0_71 = arith.constant 0 : index
      %142 = vector.load %arg5[%c15, %c0_71] : memref<16x128xi32, #tpu.memory_space<vmem>>, vector<1x128xi32>
      %143 = vector.broadcast %142 : vector<1x128xi32> to vector<8x128xi32>
      %144 = arith.cmpi eq, %21, %143 : vector<8x128xi32>
      %145 = arith.extui %144 : vector<8x128xi1> to vector<8x128xi32>
      %146 = arith.sitofp %145 : vector<8x128xi32> to vector<8x128xf32>
      %c15_72 = arith.constant 15 : index
      %c0_73 = arith.constant 0 : index
      %c0_74 = arith.constant 0 : index
      %147 = vector.load %arg10[%c15_72, %c0_73, %c0_74] : memref<16x8x128xf32, #tpu.memory_space<vmem>>, vector<1x8x128xf32>
      %148 = vector.shape_cast %147 : vector<1x8x128xf32> to vector<8x128xf32>
      %149 = vector.shape_cast %146 : vector<8x128xf32> to vector<1x8x128xf32>
      tpu.vector_store %arg10[%c15_72, %c0_73, %c0_74], %149 {strides = array<i32>} : memref<16x8x128xf32, #tpu.memory_space<vmem>>, vector<1x8x128xf32>,
    } else {
    }
    %4 = arith.index_cast %arg0 : i32 to index
    %5 = memref.load %arg2[%4] : memref<1xi32, #tpu.memory_space<smem>>
    %6 = arith.cmpi slt, %0, %5 : i32
    %7 = arith.extui %6 : i1 to i32
    %c0_i32_1 = arith.constant 0 : i32
    %8 = arith.cmpi ne, %7, %c0_i32_1 : i32
    scf.if %8 {
      %c0 = arith.constant 0 : index
      %c0_4 = arith.constant 0 : index
      %c0_5 = arith.constant 0 : index
      %12 = vector.load %arg4[%c0, %c0_4, %c0_5] : memref<16x16x8xf32, #tpu.memory_space<vmem>>, vector<1x16x8xf32>
      %13 = vector.shape_cast %12 : vector<1x16x8xf32> to vector<16x8xf32>
      %c0_6 = arith.constant 0 : index
      %c0_7 = arith.constant 0 : index
      %c0_8 = arith.constant 0 : index
      %14 = vector.load %arg10[%c0_6, %c0_7, %c0_8] : memref<16x8x128xf32, #tpu.memory_space<vmem>>, vector<1x8x128xf32>
      %15 = vector.shape_cast %14 : vector<1x8x128xf32> to vector<8x128xf32>
      %cst = arith.constant dense<0.000000e+00> : vector<16x128xf32>
      %16 = tpu.matmul %13, %15, %cst {dimension_numbers = #tpu.dot_dimension_numbers<[1], [0], [0], [1], [0, 0, 1, 1], [], []>} : vector<16x8xf32>, vector<8x128xf32>, vector<16x128xf32> -> vector<16x128xf32>
      %c0_9 = arith.constant 0 : index
      %c0_10 = arith.constant 0 : index
      %c0_11 = arith.constant 0 : index
      %17 = vector.load %arg13[%c0_9, %c0_10, %c0_11] : memref<16x16x128xf32, #tpu.memory_space<vmem>>, vector<1x16x128xf32>
      %18 = vector.shape_cast %17 : vector<1x16x128xf32> to vector<16x128xf32>
      %19 = vector.shape_cast %16 : vector<16x128xf32> to vector<1x16x128xf32>
      tpu.vector_store %arg13[%c0_9, %c0_10, %c0_11], %19 {strides = array<i32>} : memref<16x16x128xf32, #tpu.memory_space<vmem>>, vector<1x16x128xf32>,
      %c1 = arith.constant 1 : index
      %c0_12 = arith.constant 0 : index
      %c0_13 = arith.constant 0 : index
      %20 = vector.load %arg4[%c1, %c0_12, %c0_13] : memref<16x16x8xf32, #tpu.memory_space<vmem>>, vector<1x16x8xf32>
      %21 = vector.shape_cast %20 : vector<1x16x8xf32> to vector<16x8xf32>
      %c1_14 = arith.constant 1 : index
      %c0_15 = arith.constant 0 : index
      %c0_16 = arith.constant 0 : index
      %22 = vector.load %arg10[%c1_14, %c0_15, %c0_16] : memref<16x8x128xf32, #tpu.memory_space<vmem>>, vector<1x8x128xf32>
      %23 = vector.shape_cast %22 : vector<1x8x128xf32> to vector<8x128xf32>
      %cst_17 = arith.constant dense<0.000000e+00> : vector<16x128xf32>
      %24 = tpu.matmul %21, %23, %cst_17 {dimension_numbers = #tpu.dot_dimension_numbers<[1], [0], [0], [1], [0, 0, 1, 1], [], []>} : vector<16x8xf32>, vector<8x128xf32>, vector<16x128xf32> -> vector<16x128xf32>
      %c1_18 = arith.constant 1 : index
      %c0_19 = arith.constant 0 : index
      %c0_20 = arith.constant 0 : index
      %25 = vector.load %arg13[%c1_18, %c0_19, %c0_20] : memref<16x16x128xf32, #tpu.memory_space<vmem>>, vector<1x16x128xf32>
      %26 = vector.shape_cast %25 : vector<1x16x128xf32> to vector<16x128xf32>
      %27 = vector.shape_cast %24 : vector<16x128xf32> to vector<1x16x128xf32>
      tpu.vector_store %arg13[%c1_18, %c0_19, %c0_20], %27 {strides = array<i32>} : memref<16x16x128xf32, #tpu.memory_space<vmem>>, vector<1x16x128xf32>,
      %c2 = arith.constant 2 : index
      %c0_21 = arith.constant 0 : index
      %c0_22 = arith.constant 0 : index
      %28 = vector.load %arg4[%c2, %c0_21, %c0_22] : memref<16x16x8xf32, #tpu.memory_space<vmem>>, vector<1x16x8xf32>
      %29 = vector.shape_cast %28 : vector<1x16x8xf32> to vector<16x8xf32>
      %c2_23 = arith.constant 2 : index
      %c0_24 = arith.constant 0 : index
      %c0_25 = arith.constant 0 : index
      %30 = vector.load %arg10[%c2_23, %c0_24, %c0_25] : memref<16x8x128xf32, #tpu.memory_space<vmem>>, vector<1x8x128xf32>
      %31 = vector.shape_cast %30 : vector<1x8x128xf32> to vector<8x128xf32>
      %cst_26 = arith.constant dense<0.000000e+00> : vector<16x128xf32>
      %32 = tpu.matmul %29, %31, %cst_26 {dimension_numbers = #tpu.dot_dimension_numbers<[1], [0], [0], [1], [0, 0, 1, 1], [], []>} : vector<16x8xf32>, vector<8x128xf32>, vector<16x128xf32> -> vector<16x128xf32>
      %c2_27 = arith.constant 2 : index
      %c0_28 = arith.constant 0 : index
      %c0_29 = arith.constant 0 : index
      %33 = vector.load %arg13[%c2_27, %c0_28, %c0_29] : memref<16x16x128xf32, #tpu.memory_space<vmem>>, vector<1x16x128xf32>
      %34 = vector.shape_cast %33 : vector<1x16x128xf32> to vector<16x128xf32>
      %35 = vector.shape_cast %32 : vector<16x128xf32> to vector<1x16x128xf32>
      tpu.vector_store %arg13[%c2_27, %c0_28, %c0_29], %35 {strides = array<i32>} : memref<16x16x128xf32, #tpu.memory_space<vmem>>, vector<1x16x128xf32>,
      %c3 = arith.constant 3 : index
      %c0_30 = arith.constant 0 : index
      %c0_31 = arith.constant 0 : index
      %36 = vector.load %arg4[%c3, %c0_30, %c0_31] : memref<16x16x8xf32, #tpu.memory_space<vmem>>, vector<1x16x8xf32>
      %37 = vector.shape_cast %36 : vector<1x16x8xf32> to vector<16x8xf32>
      %c3_32 = arith.constant 3 : index
      %c0_33 = arith.constant 0 : index
      %c0_34 = arith.constant 0 : index
      %38 = vector.load %arg10[%c3_32, %c0_33, %c0_34] : memref<16x8x128xf32, #tpu.memory_space<vmem>>, vector<1x8x128xf32>
      %39 = vector.shape_cast %38 : vector<1x8x128xf32> to vector<8x128xf32>
      %cst_35 = arith.constant dense<0.000000e+00> : vector<16x128xf32>
      %40 = tpu.matmul %37, %39, %cst_35 {dimension_numbers = #tpu.dot_dimension_numbers<[1], [0], [0], [1], [0, 0, 1, 1], [], []>} : vector<16x8xf32>, vector<8x128xf32>, vector<16x128xf32> -> vector<16x128xf32>
      %c3_36 = arith.constant 3 : index
      %c0_37 = arith.constant 0 : index
      %c0_38 = arith.constant 0 : index
      %41 = vector.load %arg13[%c3_36, %c0_37, %c0_38] : memref<16x16x128xf32, #tpu.memory_space<vmem>>, vector<1x16x128xf32>
      %42 = vector.shape_cast %41 : vector<1x16x128xf32> to vector<16x128xf32>
      %43 = vector.shape_cast %40 : vector<16x128xf32> to vector<1x16x128xf32>
      tpu.vector_store %arg13[%c3_36, %c0_37, %c0_38], %43 {strides = array<i32>} : memref<16x16x128xf32, #tpu.memory_space<vmem>>, vector<1x16x128xf32>,
      %c4 = arith.constant 4 : index
      %c0_39 = arith.constant 0 : index
      %c0_40 = arith.constant 0 : index
      %44 = vector.load %arg4[%c4, %c0_39, %c0_40] : memref<16x16x8xf32, #tpu.memory_space<vmem>>, vector<1x16x8xf32>
      %45 = vector.shape_cast %44 : vector<1x16x8xf32> to vector<16x8xf32>
      %c4_41 = arith.constant 4 : index
      %c0_42 = arith.constant 0 : index
      %c0_43 = arith.constant 0 : index
      %46 = vector.load %arg10[%c4_41, %c0_42, %c0_43] : memref<16x8x128xf32, #tpu.memory_space<vmem>>, vector<1x8x128xf32>
      %47 = vector.shape_cast %46 : vector<1x8x128xf32> to vector<8x128xf32>
      %cst_44 = arith.constant dense<0.000000e+00> : vector<16x128xf32>
      %48 = tpu.matmul %45, %47, %cst_44 {dimension_numbers = #tpu.dot_dimension_numbers<[1], [0], [0], [1], [0, 0, 1, 1], [], []>} : vector<16x8xf32>, vector<8x128xf32>, vector<16x128xf32> -> vector<16x128xf32>
      %c4_45 = arith.constant 4 : index
      %c0_46 = arith.constant 0 : index
      %c0_47 = arith.constant 0 : index
      %49 = vector.load %arg13[%c4_45, %c0_46, %c0_47] : memref<16x16x128xf32, #tpu.memory_space<vmem>>, vector<1x16x128xf32>
      %50 = vector.shape_cast %49 : vector<1x16x128xf32> to vector<16x128xf32>
      %51 = vector.shape_cast %48 : vector<16x128xf32> to vector<1x16x128xf32>
      tpu.vector_store %arg13[%c4_45, %c0_46, %c0_47], %51 {strides = array<i32>} : memref<16x16x128xf32, #tpu.memory_space<vmem>>, vector<1x16x128xf32>,
      %c5 = arith.constant 5 : index
      %c0_48 = arith.constant 0 : index
      %c0_49 = arith.constant 0 : index
      %52 = vector.load %arg4[%c5, %c0_48, %c0_49] : memref<16x16x8xf32, #tpu.memory_space<vmem>>, vector<1x16x8xf32>
      %53 = vector.shape_cast %52 : vector<1x16x8xf32> to vector<16x8xf32>
      %c5_50 = arith.constant 5 : index
      %c0_51 = arith.constant 0 : index
      %c0_52 = arith.constant 0 : index
      %54 = vector.load %arg10[%c5_50, %c0_51, %c0_52] : memref<16x8x128xf32, #tpu.memory_space<vmem>>, vector<1x8x128xf32>
      %55 = vector.shape_cast %54 : vector<1x8x128xf32> to vector<8x128xf32>
      %cst_53 = arith.constant dense<0.000000e+00> : vector<16x128xf32>
      %56 = tpu.matmul %53, %55, %cst_53 {dimension_numbers = #tpu.dot_dimension_numbers<[1], [0], [0], [1], [0, 0, 1, 1], [], []>} : vector<16x8xf32>, vector<8x128xf32>, vector<16x128xf32> -> vector<16x128xf32>
      %c5_54 = arith.constant 5 : index
      %c0_55 = arith.constant 0 : index
      %c0_56 = arith.constant 0 : index
      %57 = vector.load %arg13[%c5_54, %c0_55, %c0_56] : memref<16x16x128xf32, #tpu.memory_space<vmem>>, vector<1x16x128xf32>
      %58 = vector.shape_cast %57 : vector<1x16x128xf32> to vector<16x128xf32>
      %59 = vector.shape_cast %56 : vector<16x128xf32> to vector<1x16x128xf32>
      tpu.vector_store %arg13[%c5_54, %c0_55, %c0_56], %59 {strides = array<i32>} : memref<16x16x128xf32, #tpu.memory_space<vmem>>, vector<1x16x128xf32>,
      %c6 = arith.constant 6 : index
      %c0_57 = arith.constant 0 : index
      %c0_58 = arith.constant 0 : index
      %60 = vector.load %arg4[%c6, %c0_57, %c0_58] : memref<16x16x8xf32, #tpu.memory_space<vmem>>, vector<1x16x8xf32>
      %61 = vector.shape_cast %60 : vector<1x16x8xf32> to vector<16x8xf32>
      %c6_59 = arith.constant 6 : index
      %c0_60 = arith.constant 0 : index
      %c0_61 = arith.constant 0 : index
      %62 = vector.load %arg10[%c6_59, %c0_60, %c0_61] : memref<16x8x128xf32, #tpu.memory_space<vmem>>, vector<1x8x128xf32>
      %63 = vector.shape_cast %62 : vector<1x8x128xf32> to vector<8x128xf32>
      %cst_62 = arith.constant dense<0.000000e+00> : vector<16x128xf32>
      %64 = tpu.matmul %61, %63, %cst_62 {dimension_numbers = #tpu.dot_dimension_numbers<[1], [0], [0], [1], [0, 0, 1, 1], [], []>} : vector<16x8xf32>, vector<8x128xf32>, vector<16x128xf32> -> vector<16x128xf32>
      %c6_63 = arith.constant 6 : index
      %c0_64 = arith.constant 0 : index
      %c0_65 = arith.constant 0 : index
      %65 = vector.load %arg13[%c6_63, %c0_64, %c0_65] : memref<16x16x128xf32, #tpu.memory_space<vmem>>, vector<1x16x128xf32>
      %66 = vector.shape_cast %65 : vector<1x16x128xf32> to vector<16x128xf32>
      %67 = vector.shape_cast %64 : vector<16x128xf32> to vector<1x16x128xf32>
      tpu.vector_store %arg13[%c6_63, %c0_64, %c0_65], %67 {strides = array<i32>} : memref<16x16x128xf32, #tpu.memory_space<vmem>>, vector<1x16x128xf32>,
      %c7 = arith.constant 7 : index
      %c0_66 = arith.constant 0 : index
      %c0_67 = arith.constant 0 : index
      %68 = vector.load %arg4[%c7, %c0_66, %c0_67] : memref<16x16x8xf32, #tpu.memory_space<vmem>>, vector<1x16x8xf32>
      %69 = vector.shape_cast %68 : vector<1x16x8xf32> to vector<16x8xf32>
      %c7_68 = arith.constant 7 : index
      %c0_69 = arith.constant 0 : index
      %c0_70 = arith.constant 0 : index
      %70 = vector.load %arg10[%c7_68, %c0_69, %c0_70] : memref<16x8x128xf32, #tpu.memory_space<vmem>>, vector<1x8x128xf32>
      %71 = vector.shape_cast %70 : vector<1x8x128xf32> to vector<8x128xf32>
      %cst_71 = arith.constant dense<0.000000e+00> : vector<16x128xf32>
      %72 = tpu.matmul %69, %71, %cst_71 {dimension_numbers = #tpu.dot_dimension_numbers<[1], [0], [0], [1], [0, 0, 1, 1], [], []>} : vector<16x8xf32>, vector<8x128xf32>, vector<16x128xf32> -> vector<16x128xf32>
      %c7_72 = arith.constant 7 : index
      %c0_73 = arith.constant 0 : index
      %c0_74 = arith.constant 0 : index
      %73 = vector.load %arg13[%c7_72, %c0_73, %c0_74] : memref<16x16x128xf32, #tpu.memory_space<vmem>>, vector<1x16x128xf32>
      %74 = vector.shape_cast %73 : vector<1x16x128xf32> to vector<16x128xf32>
      %75 = vector.shape_cast %72 : vector<16x128xf32> to vector<1x16x128xf32>
      tpu.vector_store %arg13[%c7_72, %c0_73, %c0_74], %75 {strides = array<i32>} : memref<16x16x128xf32, #tpu.memory_space<vmem>>, vector<1x16x128xf32>,
      %c8 = arith.constant 8 : index
      %c0_75 = arith.constant 0 : index
      %c0_76 = arith.constant 0 : index
      %76 = vector.load %arg4[%c8, %c0_75, %c0_76] : memref<16x16x8xf32, #tpu.memory_space<vmem>>, vector<1x16x8xf32>
      %77 = vector.shape_cast %76 : vector<1x16x8xf32> to vector<16x8xf32>
      %c8_77 = arith.constant 8 : index
      %c0_78 = arith.constant 0 : index
      %c0_79 = arith.constant 0 : index
      %78 = vector.load %arg10[%c8_77, %c0_78, %c0_79] : memref<16x8x128xf32, #tpu.memory_space<vmem>>, vector<1x8x128xf32>
      %79 = vector.shape_cast %78 : vector<1x8x128xf32> to vector<8x128xf32>
      %cst_80 = arith.constant dense<0.000000e+00> : vector<16x128xf32>
      %80 = tpu.matmul %77, %79, %cst_80 {dimension_numbers = #tpu.dot_dimension_numbers<[1], [0], [0], [1], [0, 0, 1, 1], [], []>} : vector<16x8xf32>, vector<8x128xf32>, vector<16x128xf32> -> vector<16x128xf32>
      %c8_81 = arith.constant 8 : index
      %c0_82 = arith.constant 0 : index
      %c0_83 = arith.constant 0 : index
      %81 = vector.load %arg13[%c8_81, %c0_82, %c0_83] : memref<16x16x128xf32, #tpu.memory_space<vmem>>, vector<1x16x128xf32>
      %82 = vector.shape_cast %81 : vector<1x16x128xf32> to vector<16x128xf32>
      %83 = vector.shape_cast %80 : vector<16x128xf32> to vector<1x16x128xf32>
      tpu.vector_store %arg13[%c8_81, %c0_82, %c0_83], %83 {strides = array<i32>} : memref<16x16x128xf32, #tpu.memory_space<vmem>>, vector<1x16x128xf32>,
      %c9 = arith.constant 9 : index
      %c0_84 = arith.constant 0 : index
      %c0_85 = arith.constant 0 : index
      %84 = vector.load %arg4[%c9, %c0_84, %c0_85] : memref<16x16x8xf32, #tpu.memory_space<vmem>>, vector<1x16x8xf32>
      %85 = vector.shape_cast %84 : vector<1x16x8xf32> to vector<16x8xf32>
      %c9_86 = arith.constant 9 : index
      %c0_87 = arith.constant 0 : index
      %c0_88 = arith.constant 0 : index
      %86 = vector.load %arg10[%c9_86, %c0_87, %c0_88] : memref<16x8x128xf32, #tpu.memory_space<vmem>>, vector<1x8x128xf32>
      %87 = vector.shape_cast %86 : vector<1x8x128xf32> to vector<8x128xf32>
      %cst_89 = arith.constant dense<0.000000e+00> : vector<16x128xf32>
      %88 = tpu.matmul %85, %87, %cst_89 {dimension_numbers = #tpu.dot_dimension_numbers<[1], [0], [0], [1], [0, 0, 1, 1], [], []>} : vector<16x8xf32>, vector<8x128xf32>, vector<16x128xf32> -> vector<16x128xf32>
      %c9_90 = arith.constant 9 : index
      %c0_91 = arith.constant 0 : index
      %c0_92 = arith.constant 0 : index
      %89 = vector.load %arg13[%c9_90, %c0_91, %c0_92] : memref<16x16x128xf32, #tpu.memory_space<vmem>>, vector<1x16x128xf32>
      %90 = vector.shape_cast %89 : vector<1x16x128xf32> to vector<16x128xf32>
      %91 = vector.shape_cast %88 : vector<16x128xf32> to vector<1x16x128xf32>
      tpu.vector_store %arg13[%c9_90, %c0_91, %c0_92], %91 {strides = array<i32>} : memref<16x16x128xf32, #tpu.memory_space<vmem>>, vector<1x16x128xf32>,
      %c10 = arith.constant 10 : index
      %c0_93 = arith.constant 0 : index
      %c0_94 = arith.constant 0 : index
      %92 = vector.load %arg4[%c10, %c0_93, %c0_94] : memref<16x16x8xf32, #tpu.memory_space<vmem>>, vector<1x16x8xf32>
      %93 = vector.shape_cast %92 : vector<1x16x8xf32> to vector<16x8xf32>
      %c10_95 = arith.constant 10 : index
      %c0_96 = arith.constant 0 : index
      %c0_97 = arith.constant 0 : index
      %94 = vector.load %arg10[%c10_95, %c0_96, %c0_97] : memref<16x8x128xf32, #tpu.memory_space<vmem>>, vector<1x8x128xf32>
      %95 = vector.shape_cast %94 : vector<1x8x128xf32> to vector<8x128xf32>
      %cst_98 = arith.constant dense<0.000000e+00> : vector<16x128xf32>
      %96 = tpu.matmul %93, %95, %cst_98 {dimension_numbers = #tpu.dot_dimension_numbers<[1], [0], [0], [1], [0, 0, 1, 1], [], []>} : vector<16x8xf32>, vector<8x128xf32>, vector<16x128xf32> -> vector<16x128xf32>
      %c10_99 = arith.constant 10 : index
      %c0_100 = arith.constant 0 : index
      %c0_101 = arith.constant 0 : index
      %97 = vector.load %arg13[%c10_99, %c0_100, %c0_101] : memref<16x16x128xf32, #tpu.memory_space<vmem>>, vector<1x16x128xf32>
      %98 = vector.shape_cast %97 : vector<1x16x128xf32> to vector<16x128xf32>
      %99 = vector.shape_cast %96 : vector<16x128xf32> to vector<1x16x128xf32>
      tpu.vector_store %arg13[%c10_99, %c0_100, %c0_101], %99 {strides = array<i32>} : memref<16x16x128xf32, #tpu.memory_space<vmem>>, vector<1x16x128xf32>,
      %c11 = arith.constant 11 : index
      %c0_102 = arith.constant 0 : index
      %c0_103 = arith.constant 0 : index
      %100 = vector.load %arg4[%c11, %c0_102, %c0_103] : memref<16x16x8xf32, #tpu.memory_space<vmem>>, vector<1x16x8xf32>
      %101 = vector.shape_cast %100 : vector<1x16x8xf32> to vector<16x8xf32>
      %c11_104 = arith.constant 11 : index
      %c0_105 = arith.constant 0 : index
      %c0_106 = arith.constant 0 : index
      %102 = vector.load %arg10[%c11_104, %c0_105, %c0_106] : memref<16x8x128xf32, #tpu.memory_space<vmem>>, vector<1x8x128xf32>
      %103 = vector.shape_cast %102 : vector<1x8x128xf32> to vector<8x128xf32>
      %cst_107 = arith.constant dense<0.000000e+00> : vector<16x128xf32>
      %104 = tpu.matmul %101, %103, %cst_107 {dimension_numbers = #tpu.dot_dimension_numbers<[1], [0], [0], [1], [0, 0, 1, 1], [], []>} : vector<16x8xf32>, vector<8x128xf32>, vector<16x128xf32> -> vector<16x128xf32>
      %c11_108 = arith.constant 11 : index
      %c0_109 = arith.constant 0 : index
      %c0_110 = arith.constant 0 : index
      %105 = vector.load %arg13[%c11_108, %c0_109, %c0_110] : memref<16x16x128xf32, #tpu.memory_space<vmem>>, vector<1x16x128xf32>
      %106 = vector.shape_cast %105 : vector<1x16x128xf32> to vector<16x128xf32>
      %107 = vector.shape_cast %104 : vector<16x128xf32> to vector<1x16x128xf32>
      tpu.vector_store %arg13[%c11_108, %c0_109, %c0_110], %107 {strides = array<i32>} : memref<16x16x128xf32, #tpu.memory_space<vmem>>, vector<1x16x128xf32>,
      %c12 = arith.constant 12 : index
      %c0_111 = arith.constant 0 : index
      %c0_112 = arith.constant 0 : index
      %108 = vector.load %arg4[%c12, %c0_111, %c0_112] : memref<16x16x8xf32, #tpu.memory_space<vmem>>, vector<1x16x8xf32>
      %109 = vector.shape_cast %108 : vector<1x16x8xf32> to vector<16x8xf32>
      %c12_113 = arith.constant 12 : index
      %c0_114 = arith.constant 0 : index
      %c0_115 = arith.constant 0 : index
      %110 = vector.load %arg10[%c12_113, %c0_114, %c0_115] : memref<16x8x128xf32, #tpu.memory_space<vmem>>, vector<1x8x128xf32>
      %111 = vector.shape_cast %110 : vector<1x8x128xf32> to vector<8x128xf32>
      %cst_116 = arith.constant dense<0.000000e+00> : vector<16x128xf32>
      %112 = tpu.matmul %109, %111, %cst_116 {dimension_numbers = #tpu.dot_dimension_numbers<[1], [0], [0], [1], [0, 0, 1, 1], [], []>} : vector<16x8xf32>, vector<8x128xf32>, vector<16x128xf32> -> vector<16x128xf32>
      %c12_117 = arith.constant 12 : index
      %c0_118 = arith.constant 0 : index
      %c0_119 = arith.constant 0 : index
      %113 = vector.load %arg13[%c12_117, %c0_118, %c0_119] : memref<16x16x128xf32, #tpu.memory_space<vmem>>, vector<1x16x128xf32>
      %114 = vector.shape_cast %113 : vector<1x16x128xf32> to vector<16x128xf32>
      %115 = vector.shape_cast %112 : vector<16x128xf32> to vector<1x16x128xf32>
      tpu.vector_store %arg13[%c12_117, %c0_118, %c0_119], %115 {strides = array<i32>} : memref<16x16x128xf32, #tpu.memory_space<vmem>>, vector<1x16x128xf32>,
      %c13 = arith.constant 13 : index
      %c0_120 = arith.constant 0 : index
      %c0_121 = arith.constant 0 : index
      %116 = vector.load %arg4[%c13, %c0_120, %c0_121] : memref<16x16x8xf32, #tpu.memory_space<vmem>>, vector<1x16x8xf32>
      %117 = vector.shape_cast %116 : vector<1x16x8xf32> to vector<16x8xf32>
      %c13_122 = arith.constant 13 : index
      %c0_123 = arith.constant 0 : index
      %c0_124 = arith.constant 0 : index
      %118 = vector.load %arg10[%c13_122, %c0_123, %c0_124] : memref<16x8x128xf32, #tpu.memory_space<vmem>>, vector<1x8x128xf32>
      %119 = vector.shape_cast %118 : vector<1x8x128xf32> to vector<8x128xf32>
      %cst_125 = arith.constant dense<0.000000e+00> : vector<16x128xf32>
      %120 = tpu.matmul %117, %119, %cst_125 {dimension_numbers = #tpu.dot_dimension_numbers<[1], [0], [0], [1], [0, 0, 1, 1], [], []>} : vector<16x8xf32>, vector<8x128xf32>, vector<16x128xf32> -> vector<16x128xf32>
      %c13_126 = arith.constant 13 : index
      %c0_127 = arith.constant 0 : index
      %c0_128 = arith.constant 0 : index
      %121 = vector.load %arg13[%c13_126, %c0_127, %c0_128] : memref<16x16x128xf32, #tpu.memory_space<vmem>>, vector<1x16x128xf32>
      %122 = vector.shape_cast %121 : vector<1x16x128xf32> to vector<16x128xf32>
      %123 = vector.shape_cast %120 : vector<16x128xf32> to vector<1x16x128xf32>
      tpu.vector_store %arg13[%c13_126, %c0_127, %c0_128], %123 {strides = array<i32>} : memref<16x16x128xf32, #tpu.memory_space<vmem>>, vector<1x16x128xf32>,
      %c14 = arith.constant 14 : index
      %c0_129 = arith.constant 0 : index
      %c0_130 = arith.constant 0 : index
      %124 = vector.load %arg4[%c14, %c0_129, %c0_130] : memref<16x16x8xf32, #tpu.memory_space<vmem>>, vector<1x16x8xf32>
      %125 = vector.shape_cast %124 : vector<1x16x8xf32> to vector<16x8xf32>
      %c14_131 = arith.constant 14 : index
      %c0_132 = arith.constant 0 : index
      %c0_133 = arith.constant 0 : index
      %126 = vector.load %arg10[%c14_131, %c0_132, %c0_133] : memref<16x8x128xf32, #tpu.memory_space<vmem>>, vector<1x8x128xf32>
      %127 = vector.shape_cast %126 : vector<1x8x128xf32> to vector<8x128xf32>
      %cst_134 = arith.constant dense<0.000000e+00> : vector<16x128xf32>
      %128 = tpu.matmul %125, %127, %cst_134 {dimension_numbers = #tpu.dot_dimension_numbers<[1], [0], [0], [1], [0, 0, 1, 1], [], []>} : vector<16x8xf32>, vector<8x128xf32>, vector<16x128xf32> -> vector<16x128xf32>
      %c14_135 = arith.constant 14 : index
      %c0_136 = arith.constant 0 : index
      %c0_137 = arith.constant 0 : index
      %129 = vector.load %arg13[%c14_135, %c0_136, %c0_137] : memref<16x16x128xf32, #tpu.memory_space<vmem>>, vector<1x16x128xf32>
      %130 = vector.shape_cast %129 : vector<1x16x128xf32> to vector<16x128xf32>
      %131 = vector.shape_cast %128 : vector<16x128xf32> to vector<1x16x128xf32>
      tpu.vector_store %arg13[%c14_135, %c0_136, %c0_137], %131 {strides = array<i32>} : memref<16x16x128xf32, #tpu.memory_space<vmem>>, vector<1x16x128xf32>,
      %c15 = arith.constant 15 : index
      %c0_138 = arith.constant 0 : index
      %c0_139 = arith.constant 0 : index
      %132 = vector.load %arg4[%c15, %c0_138, %c0_139] : memref<16x16x8xf32, #tpu.memory_space<vmem>>, vector<1x16x8xf32>
      %133 = vector.shape_cast %132 : vector<1x16x8xf32> to vector<16x8xf32>
      %c15_140 = arith.constant 15 : index
      %c0_141 = arith.constant 0 : index
      %c0_142 = arith.constant 0 : index
      %134 = vector.load %arg10[%c15_140, %c0_141, %c0_142] : memref<16x8x128xf32, #tpu.memory_space<vmem>>, vector<1x8x128xf32>
      %135 = vector.shape_cast %134 : vector<1x8x128xf32> to vector<8x128xf32>
      %cst_143 = arith.constant dense<0.000000e+00> : vector<16x128xf32>
      %136 = tpu.matmul %133, %135, %cst_143 {dimension_numbers = #tpu.dot_dimension_numbers<[1], [0], [0], [1], [0, 0, 1, 1], [], []>} : vector<16x8xf32>, vector<8x128xf32>, vector<16x128xf32> -> vector<16x128xf32>
      %c15_144 = arith.constant 15 : index
      %c0_145 = arith.constant 0 : index
      %c0_146 = arith.constant 0 : index
      %137 = vector.load %arg13[%c15_144, %c0_145, %c0_146] : memref<16x16x128xf32, #tpu.memory_space<vmem>>, vector<1x16x128xf32>
      %138 = vector.shape_cast %137 : vector<1x16x128xf32> to vector<16x128xf32>
      %139 = vector.shape_cast %136 : vector<16x128xf32> to vector<1x16x128xf32>
      tpu.vector_store %arg13[%c15_144, %c0_145, %c0_146], %139 {strides = array<i32>} : memref<16x16x128xf32, #tpu.memory_space<vmem>>, vector<1x16x128xf32>,
      %140 = tpu.iota {dimensions = array<i32: 1>} : vector<16x128xi32>
      %c1_i32 = arith.constant 1 : i32
      %141 = vector.broadcast %c1_i32 : i32 to vector<16x128xi32>
      %142 = arith.cmpi sge, %140, %141 : vector<16x128xi32>
      %cst_147 = arith.constant 0.000000e+00 : f32
      %cst_148 = arith.constant -1.000000e+30 : f32
      %143 = vector.broadcast %cst_147 : f32 to vector<16x128xf32>
      %144 = vector.broadcast %cst_148 : f32 to vector<16x128xf32>
      %145 = arith.select %142, %143, %144 : vector<16x128xi1>, vector<16x128xf32>
      %c0_149 = arith.constant 0 : index
      %c0_150 = arith.constant 0 : index
      %146 = vector.load %arg6[%c0_149, %c0_150] : memref<16x128xf32, #tpu.memory_space<vmem>>, vector<16x128xf32>
      %c0_151 = arith.constant 0 : index
      %c0_152 = arith.constant 0 : index
      %147 = vector.load %arg8[%c0_151, %c0_152] : memref<16x1xi32, #tpu.memory_space<vmem>>, vector<16x1xi32>
      %c1_i32_153 = arith.constant 1 : i32
      %148 = vector.broadcast %c1_i32_153 : i32 to vector<16x1xi32>
      %149 = arith.subi %147, %148 : vector<16x1xi32>
      %150 = vector.shape_cast %149 : vector<16x1xi32> to vector<16x1xi32>
      %151 = vector.broadcast %150 : vector<16x1xi32> to vector<16x128xi32>
      %152 = arith.subi %5, %0 : i32
      %c16_i32_154 = arith.constant 16 : i32
      %153 = arith.minsi %152, %c16_i32_154 : i32
      %c0_155 = arith.constant 0 : index
      %c0_156 = arith.constant 0 : index
      %154 = vector.load %arg11[%c0_155, %c0_156] : memref<16x128xf32, #tpu.memory_space<vmem>>, vector<16x128xf32>
      %c0_157 = arith.constant 0 : index
      %c0_158 = arith.constant 0 : index
      %155 = vector.load %arg12[%c0_157, %c0_158] : memref<16x128xf32, #tpu.memory_space<vmem>>, vector<16x128xf32>
      %c0_i32_159 = arith.constant 0 : i32
      %156 = arith.subi %153, %c0_i32_159 : i32
      %157 = arith.addi %c0_i32_159, %156 : i32
      %c1_i32_160 = arith.constant 1 : i32
      %158:2 = scf.for %arg14 = %c0_i32_159 to %157 step %c1_i32_160 iter_args(%arg15 = %154, %arg16 = %155) -> (vector<16x128xf32>, vector<16x128xf32>)  : i32 {
        %c1_i32_165 = arith.constant 1 : i32
        %161 = tpu.dynamic_rotate %arg15 by %c1_i32_165 dim 1 : vector<16x128xf32>, i32 -> vector<16x128xf32>
        %162 = arith.addf %161, %145 : vector<16x128xf32>
        %c2_i32 = arith.constant 2 : i32
        %163 = tpu.dynamic_rotate %arg15 by %c2_i32 dim 1 : vector<16x128xf32>, i32 -> vector<16x128xf32>
        %164 = arith.addf %163, %146 : vector<16x128xf32>
        %165 = arith.maximumf %arg15, %162 : vector<16x128xf32>
        %166 = arith.maximumf %165, %164 : vector<16x128xf32>
        %167 = arith.subf %arg15, %166 : vector<16x128xf32>
        %168 = math.exp %167 : vector<16x128xf32>
        %169 = arith.subf %162, %166 : vector<16x128xf32>
        %170 = math.exp %169 : vector<16x128xf32>
        %171 = arith.addf %168, %170 : vector<16x128xf32>
        %172 = arith.subf %164, %166 : vector<16x128xf32>
        %173 = math.exp %172 : vector<16x128xf32>
        %174 = arith.addf %171, %173 : vector<16x128xf32>
        %175 = math.log %174 : vector<16x128xf32>
        %176 = arith.addf %166, %175 : vector<16x128xf32>
        %c0_166 = arith.constant 0 : index
        %177 = arith.index_cast %arg14 : i32 to index
        %c0_167 = arith.constant 0 : index
        %178 = vector.load %arg13[%c0_166, %177, %c0_167] : memref<16x16x128xf32, #tpu.memory_space<vmem>>, vector<1x1x128xf32>
        %179 = vector.shape_cast %178 : vector<1x1x128xf32> to vector<1x128xf32>
        %c1_168 = arith.constant 1 : index
        %180 = arith.index_cast %arg14 : i32 to index
        %c0_169 = arith.constant 0 : index
        %181 = vector.load %arg13[%c1_168, %180, %c0_169] : memref<16x16x128xf32, #tpu.memory_space<vmem>>, vector<1x1x128xf32>
        %182 = vector.shape_cast %181 : vector<1x1x128xf32> to vector<1x128xf32>
        %c2_170 = arith.constant 2 : index
        %183 = arith.index_cast %arg14 : i32 to index
        %c0_171 = arith.constant 0 : index
        %184 = vector.load %arg13[%c2_170, %183, %c0_171] : memref<16x16x128xf32, #tpu.memory_space<vmem>>, vector<1x1x128xf32>
        %185 = vector.shape_cast %184 : vector<1x1x128xf32> to vector<1x128xf32>
        %c3_172 = arith.constant 3 : index
        %186 = arith.index_cast %arg14 : i32 to index
        %c0_173 = arith.constant 0 : index
        %187 = vector.load %arg13[%c3_172, %186, %c0_173] : memref<16x16x128xf32, #tpu.memory_space<vmem>>, vector<1x1x128xf32>
        %188 = vector.shape_cast %187 : vector<1x1x128xf32> to vector<1x128xf32>
        %c4_174 = arith.constant 4 : index
        %189 = arith.index_cast %arg14 : i32 to index
        %c0_175 = arith.constant 0 : index
        %190 = vector.load %arg13[%c4_174, %189, %c0_175] : memref<16x16x128xf32, #tpu.memory_space<vmem>>, vector<1x1x128xf32>
        %191 = vector.shape_cast %190 : vector<1x1x128xf32> to vector<1x128xf32>
        %c5_176 = arith.constant 5 : index
        %192 = arith.index_cast %arg14 : i32 to index
        %c0_177 = arith.constant 0 : index
        %193 = vector.load %arg13[%c5_176, %192, %c0_177] : memref<16x16x128xf32, #tpu.memory_space<vmem>>, vector<1x1x128xf32>
        %194 = vector.shape_cast %193 : vector<1x1x128xf32> to vector<1x128xf32>
        %c6_178 = arith.constant 6 : index
        %195 = arith.index_cast %arg14 : i32 to index
        %c0_179 = arith.constant 0 : index
        %196 = vector.load %arg13[%c6_178, %195, %c0_179] : memref<16x16x128xf32, #tpu.memory_space<vmem>>, vector<1x1x128xf32>
        %197 = vector.shape_cast %196 : vector<1x1x128xf32> to vector<1x128xf32>
        %c7_180 = arith.constant 7 : index
        %198 = arith.index_cast %arg14 : i32 to index
        %c0_181 = arith.constant 0 : index
        %199 = vector.load %arg13[%c7_180, %198, %c0_181] : memref<16x16x128xf32, #tpu.memory_space<vmem>>, vector<1x1x128xf32>
        %200 = vector.shape_cast %199 : vector<1x1x128xf32> to vector<1x128xf32>
        %c8_182 = arith.constant 8 : index
        %201 = arith.index_cast %arg14 : i32 to index
        %c0_183 = arith.constant 0 : index
        %202 = vector.load %arg13[%c8_182, %201, %c0_183] : memref<16x16x128xf32, #tpu.memory_space<vmem>>, vector<1x1x128xf32>
        %203 = vector.shape_cast %202 : vector<1x1x128xf32> to vector<1x128xf32>
        %c9_184 = arith.constant 9 : index
        %204 = arith.index_cast %arg14 : i32 to index
        %c0_185 = arith.constant 0 : index
        %205 = vector.load %arg13[%c9_184, %204, %c0_185] : memref<16x16x128xf32, #tpu.memory_space<vmem>>, vector<1x1x128xf32>
        %206 = vector.shape_cast %205 : vector<1x1x128xf32> to vector<1x128xf32>
        %c10_186 = arith.constant 10 : index
        %207 = arith.index_cast %arg14 : i32 to index
        %c0_187 = arith.constant 0 : index
        %208 = vector.load %arg13[%c10_186, %207, %c0_187] : memref<16x16x128xf32, #tpu.memory_space<vmem>>, vector<1x1x128xf32>
        %209 = vector.shape_cast %208 : vector<1x1x128xf32> to vector<1x128xf32>
        %c11_188 = arith.constant 11 : index
        %210 = arith.index_cast %arg14 : i32 to index
        %c0_189 = arith.constant 0 : index
        %211 = vector.load %arg13[%c11_188, %210, %c0_189] : memref<16x16x128xf32, #tpu.memory_space<vmem>>, vector<1x1x128xf32>
        %212 = vector.shape_cast %211 : vector<1x1x128xf32> to vector<1x128xf32>
        %c12_190 = arith.constant 12 : index
        %213 = arith.index_cast %arg14 : i32 to index
        %c0_191 = arith.constant 0 : index
        %214 = vector.load %arg13[%c12_190, %213, %c0_191] : memref<16x16x128xf32, #tpu.memory_space<vmem>>, vector<1x1x128xf32>
        %215 = vector.shape_cast %214 : vector<1x1x128xf32> to vector<1x128xf32>
        %c13_192 = arith.constant 13 : index
        %216 = arith.index_cast %arg14 : i32 to index
        %c0_193 = arith.constant 0 : index
        %217 = vector.load %arg13[%c13_192, %216, %c0_193] : memref<16x16x128xf32, #tpu.memory_space<vmem>>, vector<1x1x128xf32>
        %218 = vector.shape_cast %217 : vector<1x1x128xf32> to vector<1x128xf32>
        %c14_194 = arith.constant 14 : index
        %219 = arith.index_cast %arg14 : i32 to index
        %c0_195 = arith.constant 0 : index
        %220 = vector.load %arg13[%c14_194, %219, %c0_195] : memref<16x16x128xf32, #tpu.memory_space<vmem>>, vector<1x1x128xf32>
        %221 = vector.shape_cast %220 : vector<1x1x128xf32> to vector<1x128xf32>
        %c15_196 = arith.constant 15 : index
        %222 = arith.index_cast %arg14 : i32 to index
        %c0_197 = arith.constant 0 : index
        %223 = vector.load %arg13[%c15_196, %222, %c0_197] : memref<16x16x128xf32, #tpu.memory_space<vmem>>, vector<1x1x128xf32>
        %224 = vector.shape_cast %223 : vector<1x1x128xf32> to vector<1x128xf32>
        %225 = tpu.concatenate %179, %182, %185, %188, %191, %194, %197, %200, %203, %206, %209, %212, %215, %218, %221, %224 in 0 : vector<1x128xf32>, vector<1x128xf32>, vector<1x128xf32>, vector<1x128xf32>, vector<1x128xf32>, vector<1x128xf32>, vector<1x128xf32>, vector<1x128xf32>, vector<1x128xf32>, vector<1x128xf32>, vector<1x128xf32>, vector<1x128xf32>, vector<1x128xf32>, vector<1x128xf32>, vector<1x128xf32>, vector<1x128xf32> -> vector<16x128xf32>
        %226 = arith.addf %225, %176 : vector<16x128xf32>
        %227 = arith.addi %0, %arg14 : i32
        %228 = vector.broadcast %227 : i32 to vector<16x128xi32>
        %229 = arith.cmpi eq, %228, %151 : vector<16x128xi32>
        %230 = arith.select %229, %226, %arg16 : vector<16x128xi1>, vector<16x128xf32>
        scf.yield %226, %230 : vector<16x128xf32>, vector<16x128xf32>
      }
      %c0_161 = arith.constant 0 : index
      %c0_162 = arith.constant 0 : index
      %159 = vector.load %arg11[%c0_161, %c0_162] : memref<16x128xf32, #tpu.memory_space<vmem>>, vector<16x128xf32>
      tpu.vector_store %arg11[%c0_161, %c0_162], %158#0 {strides = array<i32>} : memref<16x128xf32, #tpu.memory_space<vmem>>, vector<16x128xf32>,
      %c0_163 = arith.constant 0 : index
      %c0_164 = arith.constant 0 : index
      %160 = vector.load %arg12[%c0_163, %c0_164] : memref<16x128xf32, #tpu.memory_space<vmem>>, vector<16x128xf32>
      tpu.vector_store %arg12[%c0_163, %c0_164], %158#1 {strides = array<i32>} : memref<16x128xf32, #tpu.memory_space<vmem>>, vector<16x128xf32>,
    } else {
    }
    %c0_i32_2 = arith.constant 0 : i32
    %9 = arith.cmpi eq, %arg1, %c0_i32_2 : i32
    %10 = arith.extui %9 : i1 to i32
    %c0_i32_3 = arith.constant 0 : i32
    %11 = arith.cmpi ne, %10, %c0_i32_3 : i32
    scf.if %11 {
      %c0 = arith.constant 0 : index
      %c0_4 = arith.constant 0 : index
      %12 = vector.load %arg7[%c0, %c0_4] : memref<16x128xf32, #tpu.memory_space<vmem>>, vector<16x128xf32>
      %cst = arith.constant 0.000000e+00 : f32
      %13 = vector.broadcast %cst : f32 to vector<16x128xf32>
      %14 = arith.cmpf ogt, %12, %13 : vector<16x128xf32>
      %c0_5 = arith.constant 0 : index
      %c0_6 = arith.constant 0 : index
      %15 = vector.load %arg12[%c0_5, %c0_6] : memref<16x128xf32, #tpu.memory_space<vmem>>, vector<16x128xf32>
      %cst_7 = arith.constant -1.000000e+30 : f32
      %16 = vector.broadcast %cst_7 : f32 to vector<16x128xf32>
      %17 = arith.select %14, %15, %16 : vector<16x128xi1>, vector<16x128xf32>
      %cst_8 = arith.constant dense<0xFF800000> : vector<16xf32>
      %18 = vector.multi_reduction <maximumf>, %17, %cst_8 [1] : vector<16x128xf32> to vector<16xf32>
      %19 = vector.shape_cast %18 : vector<16xf32> to vector<16x1xf32>
      %20 = vector.broadcast %19 : vector<16x1xf32> to vector<16x128xf32>
      %21 = arith.subf %17, %20 : vector<16x128xf32>
      %22 = math.exp %21 : vector<16x128xf32>
      %cst_9 = arith.constant dense<0.000000e+00> : vector<16xf32>
      %23 = vector.multi_reduction <add>, %22, %cst_9 [1] : vector<16x128xf32> to vector<16xf32>
      %24 = vector.shape_cast %23 : vector<16xf32> to vector<16x1xf32>
      %25 = math.log %24 : vector<16x1xf32>
      %26 = arith.addf %19, %25 : vector<16x1xf32>
      %cst_10 = arith.constant 0.000000e+00 : f32
      %27 = vector.broadcast %cst_10 : f32 to vector<16x1xf32>
      %28 = arith.subf %27, %26 : vector<16x1xf32>
      %c0_11 = arith.constant 0 : index
      %c0_12 = arith.constant 0 : index
      %29 = vector.load %arg9[%c0_11, %c0_12] : memref<16x1xf32, #tpu.memory_space<vmem>>, vector<16x1xf32>
      tpu.vector_store %arg9[%c0_11, %c0_12], %28 {strides = array<i32>} : memref<16x1xf32, #tpu.memory_space<vmem>>, vector<16x1xf32>,
    } else {
    }
    return
  }
  func.func @transform_0(%arg0: i32, %arg1: i32, %arg2: memref<1xi32, #tpu.memory_space<smem>>, %arg3: memref<1xi32, #tpu.memory_space<smem>>) -> (i32, i32, i32) {
    %0 = arith.index_cast %arg0 : i32 to index
    %1 = memref.load %arg3[%0] : memref<1xi32, #tpu.memory_space<smem>>
    %2 = arith.minsi %arg1, %1 : i32
    %c0_i32 = arith.constant 0 : i32
    %c0_i32_0 = arith.constant 0 : i32
    return %arg0, %2, %c0_i32 : i32, i32, i32
  }
  func.func @transform_1(%arg0: i32, %arg1: i32, %arg2: memref<1xi32, #tpu.memory_space<smem>>, %arg3: memref<1xi32, #tpu.memory_space<smem>>) -> (i32, i32) {
    %c0_i32 = arith.constant 0 : i32
    %c0_i32_0 = arith.constant 0 : i32
    return %arg0, %c0_i32 : i32, i32
  }
  func.func @transform_2(%arg0: i32, %arg1: i32, %arg2: memref<1xi32, #tpu.memory_space<smem>>, %arg3: memref<1xi32, #tpu.memory_space<smem>>) -> (i32, i32) {
    %c0_i32 = arith.constant 0 : i32
    %c0_i32_0 = arith.constant 0 : i32
    return %arg0, %c0_i32 : i32, i32
  }
  func.func @transform_3(%arg0: i32, %arg1: i32, %arg2: memref<1xi32, #tpu.memory_space<smem>>, %arg3: memref<1xi32, #tpu.memory_space<smem>>) -> (i32, i32) {
    %c0_i32 = arith.constant 0 : i32
    %c0_i32_0 = arith.constant 0 : i32
    return %arg0, %c0_i32 : i32, i32
  }
  func.func @transform_4(%arg0: i32, %arg1: i32, %arg2: memref<1xi32, #tpu.memory_space<smem>>, %arg3: memref<1xi32, #tpu.memory_space<smem>>) -> (i32, i32) {
    %c0_i32 = arith.constant 0 : i32
    %c0_i32_0 = arith.constant 0 : i32
    return %arg0, %c0_i32 : i32, i32
  }
  func.func @transform_5(%arg0: i32, %arg1: i32, %arg2: memref<1xi32, #tpu.memory_space<smem>>, %arg3: memref<1xi32, #tpu.memory_space<smem>>) -> (i32, i32) {
    %c0_i32 = arith.constant 0 : i32
    %c0_i32_0 = arith.constant 0 : i32
    return %arg0, %c0_i32 : i32, i32
  }
}

</mosaic_0001>

<bundles_post_ra>
// kernel: tpu_custom_call.1
= control target key start
LH: loop header
LB: loop body
LE: loop exit
PB: predicated region body
PF: predicated region fallthrough
CT: control target
= control target key end

     0   :  { %v61_v0 = vlaneseq  ;;  %v2373_v1 = vmov -1e+30   ;;  %v2374_v13 = vmov 0.0   ;;  %s2747_s0 = inlined_call_operand.<no memory space> [shape: s32[1], index: 0, kind: input, shape index: {}]   ;;  %s2748_s1 = inlined_call_operand.<no memory space> [shape: s32[1], index: 1, kind: input, shape index: {}]   ;;  %s2749_s4 = inlined_call_operand.vmem [shape: f32[16,128], index: 4, kind: input, shape index: {}]   ;;  %s2750_s5 = inlined_call_operand.vmem [shape: f32[16,128], index: 5, kind: input, shape index: {}]   ;;  %s2751_s6 = inlined_call_operand.vmem [shape: s32[16,1], index: 6, kind: input, shape index: {}]   ;;  %s2752_s7 = inlined_call_operand.vmem [shape: f32[16,1], index: 7, kind: output, shape index: {}]   ;;  %s2753_s3 = inlined_call_operand.vmem [shape: s32[16,128], index: 3, kind: input, shape index: {}]   ;;  %s2754_s2 = inlined_call_operand.vmem [shape: f32[2,16,8], index: 2, kind: input, shape index: {}]  }
   0x1   :  { %p1950_p0 = scmp.gt.s32.totalorder %s2748_s1, 0  ;;  %67 = vst [vmem:[#allocation4] sm:$0xff] %v2373_v1  ;;  %68 = vst [vmem:[#allocation4 + $0x8] sm:$0xff] %v2373_v1  ;;  %v1953_v2 = vld [vmem:[%s2753_s3] ss:$0 sm:$0xff]  ;;  %p1986_p2 = scmp.le.s32.totalorder %s2747_s0, 0 }
   0x2   :  { %v1955_v3 = vld [vmem:[%s2753_s3 + $0x1] ss:$0 sm:$0xff]  ;;  %v2428_v4 = vand.u32 127, %v61_v0  ;;  %v2430_v5 = vshrl.u32 %v61_v0, 7  ;;  %v1957_v6 = vld [vmem:[%s2753_s3 + $0x2] ss:$0 sm:$0xff] }
   0x3   :  { %v1959_v7 = vld [vmem:[%s2753_s3 + $0x3] ss:$0 sm:$0xff]  ;;  %s2769_s1 = smov (%p1950_p0, %s2748_s1), 0  ;;  %v1961_v8 = vld [vmem:[%s2753_s3 + $0x4] ss:$0 sm:$0xff]  ;;  %p1674_p3 = scmp.lt.s32.totalorder (!%p1986_p2), %s2747_s0, 16 }
   0x4   :  { %v1963_v9 = vld [vmem:[%s2753_s3 + $0x5] ss:$0 sm:$0xff]  ;;  %vm63_vm0 = vcmp.eq.s32.totalorder %v2428_v4, 0  ;;  %vm76_vm1 = vcmp.eq.s32.totalorder %v2430_v5, %v1953_v2  ;;  %vm85_vm2 = vcmp.eq.s32.totalorder %v2430_v5, %v1955_v3  ;;  %vm95_vm3 = vcmp.eq.s32.totalorder %v2430_v5, %v1957_v6  ;;  %v1965_v10 = vld [vmem:[%s2753_s3 + $0x6] ss:$0 sm:$0xff]  ;;  %s1951_s21 = sshll.u32 %s2769_s1, 1 }
   0x5   :  { %v1967_v11 = vld [vmem:[%s2753_s3 + $0x7] ss:$0 sm:$0xff]  ;;  %v64_v12 = vsel %vm63_vm0, 0.0, %v2373_v1  ;;  %v1954_v14 = vsel %vm76_vm1, 1.0, %v2374_v13  ;;  %v1956_v15 = vsel %vm85_vm2, 1.0, %v2374_v13  ;;  %v1958_v16 = vsel %vm95_vm3, 1.0, %v2374_v13 }
   0x6   :  { %p2460_p1 = scmp.lt.s32.totalorder %s1951_s21, 1  ;;  %65 = vst [vmem:[#allocation3] sm:$0xff] %v64_v12  ;;  %66 = vst [vmem:[#allocation3 + $0x8] sm:$0xff] %v64_v12  ;;  %vm105_vm4 = vcmp.eq.s32.totalorder %v2430_v5, %v1959_v7  ;;  %vm115_vm5 = vcmp.eq.s32.totalorder %v2430_v5, %v1961_v8  ;;  %vm125_vm6 = vcmp.eq.s32.totalorder %v2430_v5, %v1963_v9  ;;  %v1969_v17 = vld [vmem:[%s2753_s3 + $0x8] ss:$0 sm:$0xff]  ;;  %vm238_vm1 = vcmask (!%p1986_p2), 64512  }
   0x7   :  { %79 = vst [vmem:[#allocation2] sm:$0xff] %v1954_v14  ;;  %89 = vst [vmem:[#allocation2 + $0x8] sm:$0xff] %v1956_v15  ;;  %vm135_vm7 = vcmp.eq.s32.totalorder %v2430_v5, %v1965_v10  ;;  %v1971_v18 = vld [vmem:[%s2753_s3 + $0x9] ss:$0 sm:$0xff]  ;;  %v1960_v19 = vsel %vm105_vm4, 1.0, %v2374_v13  ;;  %v1962_v20 = vsel %vm115_vm5, 1.0, %v2374_v13  ;;  %vm145_vm8 = vcmp.eq.s32.totalorder %v2430_v5, %v1967_v11 }
   0x8   :  { %99 = vst [vmem:[#allocation2 + $0x10] sm:$0xff] %v1958_v16  ;;  %v1964_v21 = vsel %vm125_vm6, 1.0, %v2374_v13  ;;  %v1966_v22 = vsel %vm135_vm7, 1.0, %v2374_v13  ;;  %v1973_v23 = vld [vmem:[%s2753_s3 + $0xa] ss:$0 sm:$0xff]  ;;  %s2771_s21 = smov (!%p2460_p1, %s1951_s21), 1  ;;  %vm155_vm9 = vcmp.eq.s32.totalorder %v2430_v5, %v1969_v17  ;;  %vm165_vm10 = vcmp.eq.s32.totalorder %v2430_v5, %v1971_v18 }
   0x9   :  { %109 = vst [vmem:[#allocation2 + $0x18] sm:$0xff] %v1960_v19  ;;  %119 = vst [vmem:[#allocation2 + $0x20] sm:$0xff] %v1962_v20  ;;  %vm175_vm11 = vcmp.eq.s32.totalorder %v2430_v5, %v1973_v23  ;;  %v1975_v24 = vld [vmem:[%s2753_s3 + $0xb] ss:$0 sm:$0xff]  ;;  %v1977_v25 = vld [vmem:[%s2753_s3 + $0xc] ss:$0 sm:$0xff] }
   0xa   :  { %129 = vst [vmem:[#allocation2 + $0x28] sm:$0xff] %v1964_v21  ;;  %139 = vst [vmem:[#allocation2 + $0x30] sm:$0xff] %v1966_v22  ;;  %v1968_v26 = vsel %vm145_vm8, 1.0, %v2374_v13  ;;  %v1970_v27 = vsel %vm155_vm9, 1.0, %v2374_v13  ;;  %v1972_v28 = vsel %vm165_vm10, 1.0, %v2374_v13  ;;  %v1974_v29 = vsel %vm175_vm11, 1.0, %v2374_v13 }
   0xb   :  { %v1979_v30 = vld [vmem:[%s2753_s3 + $0xd] ss:$0 sm:$0xff]  ;;  %s1952_s11 = sshll.u32 %s2771_s21, 3  ;;  %149 = vst [vmem:[#allocation2 + $0x38] sm:$0xff] %v1968_v26  ;;  %159 = vst [vmem:[#allocation2 + $0x40] sm:$0xff] %v1970_v27  ;;  %vm185_vm12 = vcmp.eq.s32.totalorder %v2430_v5, %v1975_v24  ;;  %vm195_vm13 = vcmp.eq.s32.totalorder %v2430_v5, %v1977_v25  ;;  %234 = sbr.rel (%p1986_p2) target bundleno = 426 (0x1aa), region = 29 }
   0xc   :  { %169 = vst [vmem:[#allocation2 + $0x48] sm:$0xff] %v1972_v28  ;;  %179 = vst [vmem:[#allocation2 + $0x50] sm:$0xff] %v1974_v29  ;;  %vm205_vm14 = vcmp.eq.s32.totalorder %v2430_v5, %v1979_v30  ;;  %v1981_v31 = vld [vmem:[%s2753_s3 + $0xe] ss:$0 sm:$0xff]  ;;  %v1983_v32 = vld [vmem:[%s2753_s3 + $0xf] ss:$0 sm:$0xff]  ;;  %s2504_s18 = scalar_lea.vmem %s2754_s2, %s1952_s11 }
   0xd   :  { %v1976_v33 = vsel %vm185_vm12, 1.0, %v2374_v13  ;;  %v1978_v34 = vsel %vm195_vm13, 1.0, %v2374_v13  ;;  %v1980_v35 = vsel %vm205_vm14, 1.0, %v2374_v13  ;;  %vm215_vm15 = vcmp.eq.s32.totalorder %v2430_v5, %v1981_v31  ;;  %v235_v40 = vld [vmem:[%s2504_s18] sm:$0xff] (!%p1986_p2)  ;;  %v1989_v41 = vld [vmem:[%s2504_s18 + $0x10] sm:$0xff] (!%p1986_p2)  ;;  %v236_v42 = vld [vmem:[%s2504_s18 + $0x8] sm:$0xff] (!%p1986_p2) }
   0xe   :  { %189 = vst [vmem:[#allocation2 + $0x58] sm:$0xff] %v1976_v33  ;;  %199 = vst [vmem:[#allocation2 + $0x60] sm:$0xff] %v1978_v34  ;;  %v1982_v36 = vsel %vm215_vm15, 1.0, %v2374_v13  ;;  %vm225_vm0 = vcmp.eq.s32.totalorder %v2430_v5, %v1983_v32  ;;  %v237_v38 = vld [vmem:[#allocation2] sm:$0xff] (!%p1986_p2)  ;;  %v326_v39 = vld [vmem:[#allocation2 + $0x8] sm:$0xff] (!%p1986_p2)  ;;  %2120 = vmatprep.mubr.msk.f32.mxu0 (!%p1986_p2), %vm238_vm1, %v235_v40  ;;  %2125 = vmatprep.mubr.msk.f32.mxu1 (!%p1986_p2), %vm238_vm1, %v1989_v41  ;;  %v2375_v26 = vmov (!%p1986_p2), 0  }
   0xf   :  { %209 = vst [vmem:[#allocation2 + $0x68] sm:$0xff] %v1980_v35  ;;  %219 = vst [vmem:[#allocation2 + $0x70] sm:$0xff] %v1982_v36  ;;  %v1984_v37 = vsel %vm225_vm0, 1.0, %v2374_v13  ;;  %2118 = vmatprep.subr.mxu0 (!%p1986_p2), %v237_v38  ;;  %2123 = vmatprep.subr.mxu1 (!%p1986_p2), %v326_v39  ;;  %v1990_v43 = vld [vmem:[%s2504_s18 + $0x18] sm:$0xff] (!%p1986_p2)  ;;  %v415_v44 = vld [vmem:[#allocation2 + $0x10] sm:$0xff] (!%p1986_p2)  ;;  %vm1659_vm2 = vcmp.ge.s32.totalorder (!%p1986_p2), %v2428_v4, 1 }
  0x10   :  { %229 = vst [vmem:[#allocation2 + $0x78] sm:$0xff] %v1984_v37  ;;  %2119 = vmatpush3.msra.mxu0 (!%p1986_p2), %v237_v38  ;;  %v504_v45 = vld [vmem:[#allocation2 + $0x18] sm:$0xff] (!%p1986_p2)  ;;  %2124 = vmatpush3.msra.mxu1 (!%p1986_p2), %v326_v39  ;;  %v1993_v46 = vld [vmem:[%s2504_s18 + $0x20] sm:$0xff] (!%p1986_p2)  ;;  %v1997_v47 = vld [vmem:[%s2504_s18 + $0x30] sm:$0xff] (!%p1986_p2)  ;;  %v2376_v28 = vmov (!%p1986_p2), -1e+30  }
  0x11   :  { %2121 = vmatmul.mubr.msk.f32.vlgmr.msra.gmra.mrb[0].mxu0 (!%p1986_p2), %vm238_vm1, %v236_v42  ;;  %2126 = vmatmul.mubr.msk.f32.vlgmr.msra.gmra.mrb[0].mxu1 (!%p1986_p2), %vm238_vm1, %v1990_v43  ;;  %v1994_v48 = vld [vmem:[%s2504_s18 + $0x28] sm:$0xff] (!%p1986_p2)  ;;  %v1998_v49 = vld [vmem:[%s2504_s18 + $0x38] sm:$0xff] (!%p1986_p2)  ;;  %v593_v50 = vld [vmem:[#allocation2 + $0x20] sm:$0xff] (!%p1986_p2)  ;;  %v2589_v29 = vsel (!%p1986_p2), %vm1659_vm2, 0.0, %v2376_v28 }
  0x12   :  { %2128 = vmatprep.subr.mxu0 %v415_v44  ;;  %2133 = vmatprep.subr.mxu1 %v504_v45  ;;  %v682_v51 = vld [vmem:[#allocation2 + $0x28] sm:$0xff]  ;;  %v2001_v52 = vld [vmem:[%s2504_s18 + $0x40] sm:$0xff]  ;;  %v2005_v53 = vld [vmem:[%s2504_s18 + $0x50] sm:$0xff]  ;;  %s2604_s8 = scalar_select %p1674_p3, %s2747_s0, 16 }
  0x13   :  { %2129 = vmatpush3.msra.mxu0 %v415_v44  ;;  %2134 = vmatpush3.msra.mxu1 %v504_v45  ;;  %v2002_v54 = vld [vmem:[%s2504_s18 + $0x48] sm:$0xff]  ;;  %v2006_v55 = vld [vmem:[%s2504_s18 + $0x58] sm:$0xff]  ;;  %v771_v56 = vld [vmem:[#allocation2 + $0x30] sm:$0xff]  ;;  %s2646_s10 = smov (!%p1986_p2), 0  }
  0x14   :  { %2130 = vmatprep.mubr.msk.f32.mxu0 %vm238_vm1, %v1993_v46  ;;  %2135 = vmatprep.mubr.msk.f32.mxu1 %vm238_vm1, %v1997_v47  ;;  %v860_v57 = vld [vmem:[#allocation2 + $0x38] sm:$0xff]  ;;  %v2009_v58 = vld [vmem:[%s2504_s18 + $0x60] sm:$0xff]  ;;  %v2013_v59 = vld [vmem:[%s2504_s18 + $0x70] sm:$0xff] }
  0x15   :  { %2131 = vmatmul.mubr.msk.f32.vlgmr.msra.gmra.mrb[2].mxu0 %vm238_vm1, %v1994_v48  ;;  %2136 = vmatmul.mubr.msk.f32.vlgmr.msra.gmra.mrb[2].mxu1 %vm238_vm1, %v1998_v49  ;;  %v2010_v60 = vld [vmem:[%s2504_s18 + $0x68] sm:$0xff]  ;;  %v2014_v61 = vld [vmem:[%s2504_s18 + $0x78] sm:$0xff]  ;;  %v949_v62 = vld [vmem:[#allocation2 + $0x40] sm:$0xff] }
  0x16   :  { %2138 = vmatprep.subr.mxu0 %v593_v50  ;;  %2143 = vmatprep.subr.mxu1 %v682_v51  ;;  %v1038_v63 = vld [vmem:[#allocation2 + $0x48] sm:$0xff]  ;;  %v2017_v0 = vld [vmem:[%s2504_s18 + $0x80] sm:$0xff]  ;;  %v2021_v1 = vld [vmem:[%s2504_s18 + $0x90] sm:$0xff] }
  0x17   :  { %2139 = vmatpush3.msra.mxu0 %v593_v50  ;;  %2144 = vmatpush3.msra.mxu1 %v682_v51  ;;  %v2018_v2 = vld [vmem:[%s2504_s18 + $0x88] sm:$0xff]  ;;  %v2022_v3 = vld [vmem:[%s2504_s18 + $0x98] sm:$0xff]  ;;  %v1127_v5 = vld [vmem:[#allocation2 + $0x50] sm:$0xff] }
  0x18   :  { %2140 = vmatprep.mubr.msk.f32.mxu0 %vm238_vm1, %v2001_v52  ;;  %2145 = vmatprep.mubr.msk.f32.mxu1 %vm238_vm1, %v2005_v53  ;;  %v1216_v6 = vld [vmem:[#allocation2 + $0x58] sm:$0xff]  ;;  %v2025_v7 = vld [vmem:[%s2504_s18 + $0xa0] sm:$0xff]  ;;  %v2029_v8 = vld [vmem:[%s2504_s18 + $0xb0] sm:$0xff] }
  0x19   :  { %2141 = vmatmul.mubr.msk.f32.vlgmr.msra.gmra.mrb[4].mxu0 %vm238_vm1, %v2002_v54  ;;  %2146 = vmatmul.mubr.msk.f32.vlgmr.msra.gmra.mrb[4].mxu1 %vm238_vm1, %v2006_v55  ;;  %v2026_v9 = vld [vmem:[%s2504_s18 + $0xa8] sm:$0xff]  ;;  %v2030_v10 = vld [vmem:[%s2504_s18 + $0xb8] sm:$0xff]  ;;  %v1305_v11 = vld [vmem:[#allocation2 + $0x60] sm:$0xff] }
  0x1a   :  { %2148 = vmatprep.subr.mxu0 %v771_v56  ;;  %2153 = vmatprep.subr.mxu1 %v860_v57  ;;  %v1394_v12 = vld [vmem:[#allocation2 + $0x68] sm:$0xff]  ;;  %v2033_v13 = vld [vmem:[%s2504_s18 + $0xc0] sm:$0xff]  ;;  %v2037_v14 = vld [vmem:[%s2504_s18 + $0xd0] sm:$0xff] }
  0x1b   :  { %2149 = vmatpush3.msra.mxu0 %v771_v56  ;;  %2154 = vmatpush3.msra.mxu1 %v860_v57  ;;  %v2034_v15 = vld [vmem:[%s2504_s18 + $0xc8] sm:$0xff]  ;;  %v2038_v16 = vld [vmem:[%s2504_s18 + $0xd8] sm:$0xff]  ;;  %v1483_v17 = vld [vmem:[#allocation2 + $0x70] sm:$0xff] }
  0x1c   :  { %2150 = vmatprep.mubr.msk.f32.mxu0 %vm238_vm1, %v2009_v58  ;;  %2155 = vmatprep.mubr.msk.f32.mxu1 %vm238_vm1, %v2013_v59  ;;  %v1572_v18 = vld [vmem:[#allocation2 + $0x78] sm:$0xff]  ;;  %v1663_v19 = vld [vmem:[%s2751_s6] sm:$0xff]  ;;  %v2045_v21 = vld [vmem:[%s2504_s18 + $0xf0] sm:$0xff] }
  0x1d   :  { %2151 = vmatmul.mubr.msk.f32.vlgmr.msra.gmra.mrb[6].mxu0 %vm238_vm1, %v2010_v60  ;;  %2156 = vmatmul.mubr.msk.f32.vlgmr.msra.gmra.mrb[6].mxu1 %vm238_vm1, %v2014_v61  ;;  %v2041_v20 = vld [vmem:[%s2504_s18 + $0xe0] sm:$0xff]  ;;  %v2042_v22 = vld [vmem:[%s2504_s18 + $0xe8] sm:$0xff]  ;;  %v2046_v23 = vld [vmem:[%s2504_s18 + $0xf8] sm:$0xff]  ;;  %v2049_v24 = vadd.s32 4294967295, %v1663_v19 }
  0x1e   :  { %2158 = vmatprep.subr.mxu0 %v949_v62  ;;  %2163 = vmatprep.subr.mxu1 %v1038_v63  ;;  %v1664_v25 = vld [vmem:[%s2751_s6 + $0x8] sm:$0xff]  ;;  %v2594_v30 = vld [vmem:[%s2749_s4] sm:$0xff]  ;;  %v2610_v33 = vld [vmem:[#allocation4] sm:$0xff]  }
  0x1f   :  { %2159 = vmatpush3.msra.mxu0 %v949_v62  ;;  %2164 = vmatpush3.msra.mxu1 %v1038_v63  ;;  %v2050_v27 = vadd.s32 4294967295, %v1664_v25  ;;  %v2599_v31 = vld [vmem:[%s2749_s4 + $0x8] sm:$0xff]  ;;  %v2606_v32 = vld [vmem:[#allocation3] sm:$0xff]   ;;  %v2612_v34 = vld [vmem:[#allocation4 + $0x8] sm:$0xff]  }
  0x20   :  { %2160 = vmatprep.mubr.msk.f32.mxu0 %vm238_vm1, %v2017_v0  ;;  %2165 = vmatprep.mubr.msk.f32.mxu1 %vm238_vm1, %v2021_v1  ;;  %v2608_v4 = vld [vmem:[#allocation3 + $0x8] sm:$0xff]  }
  0x21   :  { %2161 = vmatmul.mubr.msk.f32.vlgmr.msra.gmra.mrb[8].mxu0 %vm238_vm1, %v2018_v2  ;;  %2166 = vmatmul.mubr.msk.f32.vlgmr.msra.gmra.mrb[8].mxu1 %vm238_vm1, %v2022_v3 }
  0x22   :  { %2168 = vmatprep.subr.mxu0 %v1127_v5  ;;  %2173 = vmatprep.subr.mxu1 %v1216_v6 }
  0x23   :  { %2169 = vmatpush3.msra.mxu0 %v1127_v5  ;;  %2174 = vmatpush3.msra.mxu1 %v1216_v6  ;;  %v2756_v6 = vmov %v2612_v34 }
  0x24   :  { %2170 = vmatprep.mubr.msk.f32.mxu0 %vm238_vm1, %v2025_v7  ;;  %2175 = vmatprep.mubr.msk.f32.mxu1 %vm238_vm1, %v2029_v8  ;;  %v2757_v7 = vmov %v2610_v33  ;;  %v2758_v8 = vmov %v2608_v4 }
  0x25   :  { %2171 = vmatmul.mubr.msk.f32.vlgmr.msra.gmra.mrb[10].mxu0 %vm238_vm1, %v2026_v9  ;;  %2176 = vmatmul.mubr.msk.f32.vlgmr.msra.gmra.mrb[10].mxu1 %vm238_vm1, %v2030_v10  ;;  %v2759_v9 = vmov %v2606_v32 }
  0x26   :  { %2178 = vmatprep.subr.mxu0 %v1305_v11  ;;  %2183 = vmatprep.subr.mxu1 %v1394_v12 }
  0x27   :  { %2179 = vmatpush3.msra.mxu0 %v1305_v11  ;;  %2184 = vmatpush3.msra.mxu1 %v1394_v12 }
  0x28   :  { %2180 = vmatprep.mubr.msk.f32.mxu0 %vm238_vm1, %v2033_v13  ;;  %2185 = vmatprep.mubr.msk.f32.mxu1 %vm238_vm1, %v2037_v14 }
  0x29   :  { %2181 = vmatmul.mubr.msk.f32.vlgmr.msra.gmra.mrb[12].mxu0 %vm238_vm1, %v2034_v15  ;;  %2186 = vmatmul.mubr.msk.f32.vlgmr.msra.gmra.mrb[12].mxu1 %vm238_vm1, %v2038_v16 }
  0x2a   :  { %2188 = vmatprep.subr.mxu0 %v1483_v17  ;;  %2193 = vmatprep.subr.mxu1 %v1572_v18 }
  0x2b   :  { %2189 = vmatpush3.msra.mxu0 %v1483_v17  ;;  %2194 = vmatpush3.msra.mxu1 %v1572_v18 }
  0x2c   :  { %2190 = vmatprep.mubr.msk.f32.mxu0 %vm238_vm1, %v2041_v20  ;;  %2195 = vmatprep.mubr.msk.f32.mxu1 %vm238_vm1, %v2045_v21 }
  0x2d   :  { %2191 = vmatmul.mubr.msk.f32.vlgmr.msra.gmra.mrb[14].mxu0 %vm238_vm1, %v2042_v22  ;;  %2196 = vmatmul.mubr.msk.f32.vlgmr.msra.gmra.mrb[14].mxu1 %vm238_vm1, %v2046_v23 }
  0x2e   :  { %2276 = vset.pattern.permute.xlu0 %v2375_v26 }
  0x2f   :  { %1668 = vperm.xlu0 %2276, %v2049_v24  }
  0x33   :  { %1671 = vperm.xlu0 %2276, %v2050_v27  }
  0xae   :  { %v2614_v35 = vpop.permute.xlu0 %1668 }
  0xb2   :  { %v2616_v36 = vpop.permute.xlu0 %1671 }
  0xe4   :  { %v2122_v37 = vpop.f32.mrb[0].mxu0  ;;  %v2127_v38 = vpop.f32.mrb[0].mxu1 }
  0xe5   :  { %321 = vst [vmem:[#allocation5 + $0x8] sm:$0xff] %v2122_v37  ;;  %410 = vst [vmem:[#allocation5 + $0x18] sm:$0xff] %v2127_v38  ;;  %v311_v39 = vpop.f32.mrb[1].mxu0  ;;  %v399_v40 = vpop.f32.mrb[1].mxu1 }
  0xe6   :  { %320 = vst [vmem:[#allocation5] sm:$0xff] %v311_v39  ;;  %409 = vst [vmem:[#allocation5 + $0x10] sm:$0xff] %v399_v40 }
  0xe8   :  { %v2132_v41 = vpop.f32.mrb[2].mxu0  ;;  %v2137_v42 = vpop.f32.mrb[2].mxu1 }
  0xe9   :  { %499 = vst [vmem:[#allocation5 + $0x28] sm:$0xff] %v2132_v41  ;;  %588 = vst [vmem:[#allocation5 + $0x38] sm:$0xff] %v2137_v42  ;;  %v488_v43 = vpop.f32.mrb[3].mxu0  ;;  %v577_v44 = vpop.f32.mrb[3].mxu1 }
  0xea   :  { %498 = vst [vmem:[#allocation5 + $0x20] sm:$0xff] %v488_v43  ;;  %587 = vst [vmem:[#allocation5 + $0x30] sm:$0xff] %v577_v44 }
  0xec   :  { %v2142_v45 = vpop.f32.mrb[4].mxu0  ;;  %v2147_v46 = vpop.f32.mrb[4].mxu1 }
  0xed   :  { %677 = vst [vmem:[#allocation5 + $0x48] sm:$0xff] %v2142_v45  ;;  %766 = vst [vmem:[#allocation5 + $0x58] sm:$0xff] %v2147_v46  ;;  %v666_v47 = vpop.f32.mrb[5].mxu0  ;;  %v755_v48 = vpop.f32.mrb[5].mxu1 }
  0xee   :  { %676 = vst [vmem:[#allocation5 + $0x40] sm:$0xff] %v666_v47  ;;  %765 = vst [vmem:[#allocation5 + $0x50] sm:$0xff] %v755_v48 }
  0xf0   :  { %v2152_v49 = vpop.f32.mrb[6].mxu0  ;;  %v2157_v50 = vpop.f32.mrb[6].mxu1 }
  0xf1   :  { %855 = vst [vmem:[#allocation5 + $0x68] sm:$0xff] %v2152_v49  ;;  %944 = vst [vmem:[#allocation5 + $0x78] sm:$0xff] %v2157_v50  ;;  %v844_v51 = vpop.f32.mrb[7].mxu0  ;;  %v933_v52 = vpop.f32.mrb[7].mxu1 }
  0xf2   :  { %854 = vst [vmem:[#allocation5 + $0x60] sm:$0xff] %v844_v51  ;;  %943 = vst [vmem:[#allocation5 + $0x70] sm:$0xff] %v933_v52 }
  0xf4   :  { %v2162_v53 = vpop.f32.mrb[8].mxu0  ;;  %v2167_v54 = vpop.f32.mrb[8].mxu1 }
  0xf5   :  { %1033 = vst [vmem:[#allocation5 + $0x88] sm:$0xff] %v2162_v53  ;;  %1122 = vst [vmem:[#allocation5 + $0x98] sm:$0xff] %v2167_v54  ;;  %v1022_v55 = vpop.f32.mrb[9].mxu0  ;;  %v1111_v56 = vpop.f32.mrb[9].mxu1 }
  0xf6   :  { %1032 = vst [vmem:[#allocation5 + $0x80] sm:$0xff] %v1022_v55  ;;  %1121 = vst [vmem:[#allocation5 + $0x90] sm:$0xff] %v1111_v56 }
  0xf8   :  { %v2172_v57 = vpop.f32.mrb[10].mxu0  ;;  %v2177_v58 = vpop.f32.mrb[10].mxu1 }
  0xf9   :  { %1211 = vst [vmem:[#allocation5 + $0xa8] sm:$0xff] %v2172_v57  ;;  %1300 = vst [vmem:[#allocation5 + $0xb8] sm:$0xff] %v2177_v58  ;;  %v1200_v59 = vpop.f32.mrb[11].mxu0  ;;  %v1289_v60 = vpop.f32.mrb[11].mxu1 }
  0xfa   :  { %1210 = vst [vmem:[#allocation5 + $0xa0] sm:$0xff] %v1200_v59  ;;  %1299 = vst [vmem:[#allocation5 + $0xb0] sm:$0xff] %v1289_v60 }
  0xfc   :  { %v2182_v61 = vpop.f32.mrb[12].mxu0  ;;  %v2187_v62 = vpop.f32.mrb[12].mxu1  ;;  %1939 = sbr.rel (%p1986_p2) target bundleno = 424 (0x1a8), region = 132 }
  0xfd   :  { %1389 = vst [vmem:[#allocation5 + $0xc8] sm:$0xff] %v2182_v61  ;;  %1478 = vst [vmem:[#allocation5 + $0xd8] sm:$0xff] %v2187_v62  ;;  %v1378_v63 = vpop.f32.mrb[13].mxu0  ;;  %v1467_v0 = vpop.f32.mrb[13].mxu1 }
  0xfe   :  { %1388 = vst [vmem:[#allocation5 + $0xc0] sm:$0xff] %v1378_v63  ;;  %1477 = vst [vmem:[#allocation5 + $0xd0] sm:$0xff] %v1467_v0 }
 0x100   :  { %v2192_v1 = vpop.f32.mrb[14].mxu0  ;;  %v2197_v2 = vpop.f32.mrb[14].mxu1 }
 0x101   :  { %1567 = vst [vmem:[#allocation5 + $0xe8] sm:$0xff] %v2192_v1  ;;  %1656 = vst [vmem:[#allocation5 + $0xf8] sm:$0xff] %v2197_v2  ;;  %v1556_v3 = vpop.f32.mrb[15].mxu0  ;;  %v1645_v5 = vpop.f32.mrb[15].mxu1 }
 0x102   :  { %1566 = vst [vmem:[#allocation5 + $0xe0] sm:$0xff] %v1556_v3  ;;  %1655 = vst [vmem:[#allocation5 + $0xf0] sm:$0xff] %v1645_v5 }
 0x103 LB: > { %s2377_s0 = smov 1   ;;  %s2378_s11 = smov 2   ;;  %vm1823_vm3 = vcmask 1040384   ;;  %vm1825_vm4 = vcmask 1041408   ;;  %vm1827_vm5 = vcmask 1042432   ;;  %vm1829_vm6 = vcmask 1043456   ;;  %s2355_s10 = sphi %s2646_s10, %s1683_s10   ;;  %v2351_v32 = vphi %v2606_v32, %v2763_v32   ;;  %v2347_v4 = vphi %v2608_v4, %v2762_v4   ;;  %v2343_v33 = vphi %v2610_v33, %v2761_v33   ;;  %v2339_v34 = vphi %v2612_v34, %v2760_v34  }
 0x104   : > { %1690 = vrot.lane.b32.xlu0 %v2351_v32, %s2377_s0  ;;  %1696 = vrot.lane.b32.xlu1 %v2351_v32, %s2378_s11  ;;  %s2674_s12 = scalar_lea.vmem [#allocation5], %s2355_s10  ;;  %vm1831_vm7 = vcmask 1044480   ;;  %vm1833_vm8 = vcmask 1045504   ;;  %vm1835_vm9 = vcmask 1046528  }
 0x108   : > { %1692 = vrot.lane.b32.xlu0 %v2347_v4, %s2377_s0  ;;  %1698 = vrot.lane.b32.xlu1 %v2347_v4, %s2378_s11 }
 0x109   : > { %v2052_v40 = vld [vmem:[%s2674_s12 + $0x10] sm:$0x1]  ;;  %v1735_v43 = vld [vmem:[%s2674_s12] sm:$0x1] }
 0x10a   : > { %v1782_v42 = vrot.slane %v2052_v40, 7  ;;  %v2060_v44 = vld [vmem:[%s2674_s12 + $0x90] sm:$0x1]  ;;  %v2061_v49 = vld [vmem:[%s2674_s12 + $0xa0] sm:$0x1] }
 0x10b   : > { %v2054_v45 = vld [vmem:[%s2674_s12 + $0x30] sm:$0x1]  ;;  %v1803_v50 = vrot.slane %v2060_v44, 7  ;;  %v2059_v52 = vld [vmem:[%s2674_s12 + $0x80] sm:$0x1]  ;;  %v1806_v59 = vrot.slane %v2061_v49, 6 }
 0x10c   : > { %v1824_v48 = vsel %vm1823_vm3, %v1735_v43, %v1782_v42  ;;  %v2055_v53 = vld [vmem:[%s2674_s12 + $0x40] sm:$0x1]  ;;  %v1788_v54 = vrot.slane %v2054_v45, 5  ;;  %v2062_v58 = vld [vmem:[%s2674_s12 + $0xb0] sm:$0x1] }
 0x10d   : > { %v1837_v62 = vsel %vm1823_vm3, %v2059_v52, %v1803_v50  ;;  %v2056_v0 = vld [vmem:[%s2674_s12 + $0x50] sm:$0x1]  ;;  %v1791_v1 = vrot.slane %v2055_v53, 4  ;;  %v2063_v3 = vld [vmem:[%s2674_s12 + $0xc0] sm:$0x1]  ;;  %v1809_v5 = vrot.slane %v2062_v58, 5 }
 0x10e   : > { %v1838_v8 = vsel %vm1825_vm4, %v1837_v62, %v1806_v59  ;;  %v2057_v9 = vld [vmem:[%s2674_s12 + $0x60] sm:$0x1] }
 0x176   : > { %v1691_v10 = vpop.permute.xlu0 %1690  ;;  %v1697_v11 = vpop.permute.xlu1 %1696 }
 0x177   : > { %v1694_v12 = vadd.f32 %v1691_v10, %v2589_v29  ;;  %v1700_v13 = vadd.f32 %v1697_v11, %v2594_v30  ;;  %v1794_v10 = vrot.slane %v2056_v0, 3 }
 0x179   : > { %v1702_v14 = vmax.f32 %v2351_v32, %v1694_v12 }
 0x17a   : > { %v1693_v15 = vpop.permute.xlu0 %1692  ;;  %v1699_v16 = vpop.permute.xlu1 %1698 }
 0x17b   : > { %v2661_v17 = vmax.f32 %v1702_v14, %v1700_v13  ;;  %v1695_v18 = vadd.f32 %v1693_v15, %v2589_v29  ;;  %v1701_v19 = vadd.f32 %v1699_v16, %v2599_v31  ;;  %v1812_v14 = vrot.slane %v2063_v3, 4  ;;  %v2058_v16 = vld [vmem:[%s2674_s12 + $0x70] sm:$0x1] }
 0x17c   : > { %v1839_v15 = vsel %vm1827_vm5, %v1838_v8, %v1809_v5 }
 0x17d   : > { %v1706_v20 = vsub.f32 %v2351_v32, %v2661_v17  ;;  %v1712_v21 = vsub.f32 %v1694_v12, %v2661_v17  ;;  %v1720_v22 = vsub.f32 %v1700_v13, %v2661_v17  ;;  %v1703_v23 = vmax.f32 %v2347_v4, %v1695_v18  ;;  %v2064_v13 = vld [vmem:[%s2674_s12 + $0xd0] sm:$0x1] }
 0x17f   : > { %v1708_v24 = vmul.f32 1.442695, %v1706_v20  ;;  %v1714_v25 = vmul.f32 1.442695, %v1712_v21  ;;  %v2668_v26 = vmax.f32 %v1703_v23, %v1701_v19  ;;  %v1722_v27 = vmul.f32 1.442695, %v1720_v22 }
 0x180   : > { %v2065_v20 = vld [vmem:[%s2674_s12 + $0xe0] sm:$0x1]  ;;  %v1815_v21 = vrot.slane %v2064_v13, 3  ;;  %v1840_v22 = vsel %vm1829_vm6, %v1839_v15, %v1812_v14  ;;  %v1800_v23 = vrot.slane %v2058_v16, 1 }
 0x181   : > { %2277 = vpow2.f32 %v1708_v24  ;;  %v1707_v28 = vsub.f32 %v2347_v4, %v2668_v26  ;;  %v1713_v37 = vsub.f32 %v1695_v18, %v2668_v26  ;;  %v1721_v38 = vsub.f32 %v1701_v19, %v2668_v26  ;;  %v2053_v4 = vld [vmem:[%s2674_s12 + $0x20] sm:$0x1] }
 0x182   : > { %2279 = vpow2.f32 %v1714_v25  ;;  %v1785_v46 = vrot.slane %v2053_v4, 6  ;;  %v1797_v18 = vrot.slane %v2057_v9, 2  ;;  %v2066_v25 = vld [vmem:[%s2674_s12 + $0xf0] sm:$0x1] }
 0x183   : > { %v1710_v39 = vmul.f32 1.442695, %v1707_v28  ;;  %v1716_v32 = vmul.f32 1.442695, %v1713_v37  ;;  %2281 = vpow2.f32 %v1722_v27  ;;  %v1724_v41 = vmul.f32 1.442695, %v1721_v38 }
 0x184   : > { %v1826_v57 = vsel %vm1825_vm4, %v1824_v48, %v1785_v46  ;;  %v1818_v27 = vrot.slane %v2065_v20, 2  ;;  %v1841_v37 = vsel %vm1831_vm7, %v1840_v22, %v1815_v21  ;;  %v1847_v38 = vstv %s2355_s10  ;;  %s1683_s10 = sadd.s32 1, %s2355_s10  }
 0x185   : > { %2283 = vpow2.f32 %v1710_v39  ;;  %v1828_v2 = vsel %vm1827_vm5, %v1826_v57, %v1788_v54  ;;  %v1821_v40 = vrot.slane %v2066_v25, 1  ;;  %vm1848_vm10 = vcmp.eq.s32.totalorder %v1847_v38, %v2614_v35  ;;  %p1682_p4 = scmp.ge.s32.totalorder %s1683_s10, %s2604_s8 }
 0x186   : > { %2285 = vpow2.f32 %v1716_v32  ;;  %v1830_v12 = vsel %vm1829_vm6, %v1828_v2, %v1791_v1  ;;  %v1842_v4 = vsel %vm1833_vm8, %v1841_v37, %v1818_v27  ;;  %vm1849_vm11 = vcmp.eq.s32.totalorder %v1847_v38, %v2616_v36 }
 0x187   : > { %2287 = vpow2.f32 %v1724_v41  ;;  %v1832_v19 = vsel %vm1831_vm7, %v1830_v12, %v1794_v10  ;;  %v1843_v45 = vsel %vm1835_vm9, %v1842_v4, %v1821_v40 }
 0x188   : > { %v1834_v24 = vsel %vm1833_vm8, %v1832_v19, %v1797_v18 }
 0x189   : > { %v1836_v32 = vsel %vm1835_vm9, %v1834_v24, %v1800_v23 }
 0x18b   : > { %v2278_v47 = vpop.eup %2277 }
 0x18c   : > { %v2280_v51 = vpop.eup %2279 }
 0x18d   : > { %v1718_v55 = vadd.f32 %v2280_v51, %v2278_v47  ;;  %v2282_v56 = vpop.eup %2281 }
 0x18f   : > { %v2284_v60 = vpop.eup %2283  ;;  %v1726_v61 = vadd.f32 %v2282_v56, %v1718_v55 }
 0x190   : > { %v2286_v63 = vpop.eup %2285 }
 0x191   : > { %2289 = vlog2.f32 %v1726_v61  ;;  %v1719_v6 = vadd.f32 %v2286_v63, %v2284_v60  ;;  %v2288_v7 = vpop.eup %2287 }
 0x193   : > { %v1727_v11 = vadd.f32 %v2288_v7, %v1719_v6 }
 0x195   : > { %2291 = vlog2.f32 %v1727_v11 }
 0x19b   : > { %v2290_v28 = vpop.eup %2289 }
 0x19c   : > { %v1729_v39 = vmul.f32 0.6931472, %v2290_v28 }
 0x19e   : > { %v1732_v41 = vadd.f32 %v1729_v39, %v2661_v17 }
 0x19f   : > { %v2292_v42 = vpop.eup %2291 }
 0x1a0   : > { %v1844_v43 = vadd.f32 %v1836_v32, %v1732_v41   ;;  %v1731_v44 = vmul.f32 0.6931472, %v2292_v42 }
 0x1a1   :  { %1685 = sbr.rel (!%p1682_p4) target bundleno = 259 (0x103), region = 138 }
 0x1a2   : > { %v1850_v46 = vsel %vm1848_vm10, %v1844_v43, %v2343_v33   ;;  %v1733_v47 = vadd.f32 %v1731_v44, %v2668_v26  ;;  %v2763_v32 = vmov %v1844_v43  ;;  %v2767_v9 = vmov (%p1682_p4), %v1844_v43 }
 0x1a3   : > { %v2761_v33 = vmov %v1850_v46  ;;  %v2765_v7 = vmov (%p1682_p4), %v1850_v46 }
 0x1a4   : > { %v1845_v48 = vadd.f32 %v1843_v45, %v1733_v47  }
 0x1a6   : > { %v1851_v49 = vsel %vm1849_vm11, %v1845_v48, %v2339_v34   ;;  %v2762_v4 = vmov %v1845_v48  ;;  %v2766_v8 = vmov (%p1682_p4), %v1845_v48 }
 0x1a7   : > { %v2760_v34 = vmov %v1851_v49  ;;  %v2764_v6 = vmov (%p1682_p4), %v1851_v49 }
 0x1a8 PF:  { %1852 = vst [vmem:[#allocation3] sm:$0xff] %v2371_v9  ;;  %1853 = vst [vmem:[#allocation3 + $0x8] sm:$0xff] %v2367_v8  ;;  %v2371_v9 = vphi %v2759_v9, %v2767_v9   ;;  %v2367_v8 = vphi %v2758_v8, %v2766_v8   ;;  %v2363_v7 = vphi %v2757_v7, %v2765_v7   ;;  %v2359_v6 = vphi %v2756_v6, %v2764_v6  }
 0x1a9   :  { %1854 = vst [vmem:[#allocation4] sm:$0xff] %v2363_v7  ;;  %1855 = vst [vmem:[#allocation4 + $0x8] sm:$0xff] %v2359_v6 }
 0x1aa PF:  { %v1859_v29 = vld [vmem:[%s2750_s5] sm:$0xff]  ;;  %v1860_v31 = vld [vmem:[%s2750_s5 + $0x8] sm:$0xff]  ;;  %vm1889_vm14 = vcmask 7168  }
 0x1ab   :  { %vm1861_vm12 = vcmp.gt.f32.partialorder %v1859_v29, 0.0  ;;  %vm1862_vm13 = vcmp.gt.f32.partialorder %v1860_v31, 0.0 }
 0x1b0   :  { %v1863_v30 = vld [vmem:[#allocation4] sm:$0xff]  ;;  %v1864_v33 = vld [vmem:[#allocation4 + $0x8] sm:$0xff] }
 0x1b1   :  { %v1865_v34 = vsel %vm1861_vm12, %v1863_v30, -1e+30  ;;  %v1866_v35 = vsel %vm1862_vm13, %v1864_v33, -1e+30 }
 0x1b2   :  { %1867 = vmax.xlane.f32.xlu0 %v1865_v34 }
 0x1b6   :  { %1869 = vmax.xlane.f32.xlu0 %v1866_v35 }
 0x23f   :  { %v1868_v36 = vpop.xlane.xlu0 %1867 }
 0x240   :  { %v1871_v17 = vsub.f32 %v1865_v34, %v1868_v36 }
 0x242   :  { %v1873_v26 = vmul.f32 1.442695, %v1871_v17 }
 0x243   :  { %v1870_v50 = vpop.xlane.xlu0 %1869 }
 0x244   :  { %v1872_v51 = vsub.f32 %v1866_v35, %v1870_v50  ;;  %2293 = vpow2.f32 %v1873_v26 }
 0x246   :  { %v1875_v52 = vmul.f32 1.442695, %v1872_v51 }
 0x248   :  { %2295 = vpow2.f32 %v1875_v52 }
 0x24e   :  { %v2294_v53 = vpop.eup %2293 }
 0x24f   :  { %1877 = vadd.xlane.f32.xlu1 %v2294_v53 }
 0x252   :  { %v2296_v54 = vpop.eup %2295 }
 0x253   :  { %1879 = vadd.xlane.f32.xlu1 %v2296_v54 }
 0x2dc   :  { %v1878_v55 = vpop.xlane.xlu1 %1877 }
 0x2dd   :  { %2297 = vlog2.f32 %v1878_v55 }
 0x2e0   :  { %v1880_v56 = vpop.xlane.xlu1 %1879 }
 0x2e1   :  { %2299 = vlog2.f32 %v1880_v56 }
 0x2e7   :  { %v2298_v57 = vpop.eup %2297 }
 0x2e8   :  { %v1882_v58 = vmul.f32 0.6931472, %v2298_v57 }
 0x2ea   :  { %v1885_v59 = vadd.f32 %v1882_v58, %v1868_v36 }
 0x2eb   :  { %v2300_v60 = vpop.eup %2299 }
 0x2ec   :  { %v1887_v61 = vsub.f32 0.0, %v1885_v59  ;;  %v1884_v62 = vmul.f32 0.6931472, %v2300_v60 }
 0x2ee   :  { %1890 = vst.msk [vmem:[%s2752_s7] sm:$0xff] %vm1889_vm14, %v1887_v61  ;;  %v1886_v63 = vadd.f32 %v1884_v62, %v1870_v50 }
 0x2f0   :  { %v1888_v0 = vsub.f32 0.0, %v1886_v63 }
 0x2f2   :  { %1891 = vst.msk [vmem:[%s2752_s7 + $0x8] sm:$0xff] %vm1889_vm14, %v1888_v0 }

</bundles_post_ra>
